<compile_context>
chip_gen: v5e
topology: v5e:2x2
jax: 0.10.0
libtpu: 0.0.40
codegen_flags: <defaults>
</compile_context>

<pallas_src>
import functools
import math

import jax
import jax.numpy as jnp
from jax.experimental import pallas as pl
from jax.experimental.pallas import tpu as pltpu


def _block_kernel(x_ref,
                  ln1_g_ref, ln1_b_ref,
                  w_in_ref, b_in_ref,
                  w_out_ref, b_out_ref,
                  ln2_g_ref, ln2_b_ref,
                  w1_ref, b1_ref,
                  w2_ref, b2_ref,
                  o_ref,
                  *, num_heads, seq_len, approx_recip):
    N, E = x_ref.shape                 # N = batch_tile * seq
    S = seq_len
    BT = N // S
    H = num_heads
    Dh = E // H
    eps = 1e-5
    cdt = w_in_ref.dtype               # dtype fed to the MXU (f32 or bf16)

    def layernorm(v, g, b):
        # One-pass variance: E[x^2] - mu^2 (halves the XLU lane reductions).
        mu = jnp.mean(v, axis=-1, keepdims=True)
        var = jnp.mean(v * v, axis=-1, keepdims=True) - mu * mu
        return (v - mu) * jax.lax.rsqrt(var + eps) * g + b

    x = x_ref[...].astype(jnp.float32)

    # --- ln_1 (the residual below adds the *normalized* x, matching the
    #     original module, which reassigns x = ln_1(x)) ----------------------
    xn = layernorm(x, ln1_g_ref[...], ln1_b_ref[...])                  # (N, E)

    # --- fused QKV projection: ONE big MXU matmul over all BT*S rows.
    #     1/sqrt(Dh) is pre-folded into the Q columns of w_in / b_in. --------
    qkv = jnp.dot(xn.astype(cdt), w_in_ref[...],
                  preferred_element_type=jnp.float32) + b_in_ref[...]  # (N, 3E)

    q_all = qkv[:, :E].astype(cdt)            # value-level lane slices,
    k_all = qkv[:, E:2 * E].astype(cdt)       # no scratch, no stores
    v_all = qkv[:, 2 * E:].astype(cdt)

    # --- causal mask generated in-kernel (no (S,S) HBM input / VMEM copy) ---
    row = jax.lax.broadcasted_iota(jnp.int32, (S, S), 0)
    col = jax.lax.broadcasted_iota(jnp.int32, (S, S), 1)
    keep = (col <= row)[None, :, :]                                    # (1,S,S)

    # --- attention: per-head batched 3-D contractions over the BT batch tile;
    #     the out-projection is accumulated per head against the matching
    #     (Dh, E) row slab of W_out, so merged heads are never materialized.
    # TODO(synk): flash-style KV tiling for large S.
    attn = jnp.zeros((N, E), jnp.float32)
    for h in range(H):                        # static unroll over heads only
        c0 = h * Dh
        qh = q_all[:, c0:c0 + Dh].reshape(BT, S, Dh)
        kh = k_all[:, c0:c0 + Dh].reshape(BT, S, Dh)
        vh = v_all[:, c0:c0 + Dh].reshape(BT, S, Dh)
        s = jnp.einsum('bqd,bkd->bqk', qh, kh,
                       preferred_element_type=jnp.float32)             # (BT,S,S)
        s = jnp.where(keep, s, -jnp.inf)
        s = s - jnp.max(s, axis=-1, keepdims=True)
        p = jnp.exp(s)
        p = p * pl.reciprocal(jnp.sum(p, axis=-1, keepdims=True),
                              approx=approx_recip)
        ctx = jnp.einsum('bqk,bkd->bqd', p.astype(cdt), vh,
                         preferred_element_type=jnp.float32)            # (BT,S,Dh)
        attn = attn + jnp.dot(ctx.reshape(N, Dh).astype(cdt),
                              w_out_ref[c0:c0 + Dh, :],
                              preferred_element_type=jnp.float32)       # (N, E)

    x1 = xn + attn + b_out_ref[...]

    # --- ln_2 + MLP (Linear -> exact erf-GELU -> Linear) --------------------
    x2 = layernorm(x1, ln2_g_ref[...], ln2_b_ref[...])
    h1 = jnp.dot(x2.astype(cdt), w1_ref[...],
                 preferred_element_type=jnp.float32) + b1_ref[...]
    # Exact erf-GELU to match nn.GELU; switch to jax.nn.gelu(approximate=True)
    # if tanh-GELU parity is acceptable (keeps the work on the idle EUP slot).
    h1 = 0.5 * h1 * (1.0 + jax.lax.erf(h1 * (1.0 / math.sqrt(2.0))))
    m = jnp.dot(h1.astype(cdt), w2_ref[...],
                preferred_element_type=jnp.float32) + b2_ref[...]

    o_ref[...] = (x1 + m).astype(o_ref.dtype)


def _pick_batch_tile(B, S, E, H, cbytes, vmem_budget, max_rows_cap=1024):
    """Largest divisor bt of B with bt*S rows inside a rough VMEM budget,
    rows a multiple of 8, and grid = B // bt >= 2 when B >= 2 (so the single
    'parallel' grid axis can shard across megacore / v7x's two TensorCores)."""
    weights = 12 * E * E * cbytes                      # W_in + W_out + MLP
    per_row = 4 * (13 * E + 2 * S + 3 * (E // H) + 4 * E)   # live f32 + io bufs
    avail = max(vmem_budget - 2 * weights, vmem_budget // 4)
    max_rows = min(max_rows_cap, max(S, int(0.5 * avail // per_row)))
    best = None
    for cand in range(1, B + 1):
        if B % cand:
            continue
        rows = cand * S
        if rows % 8 or rows > max_rows:
            continue
        if B >= 2 and B // cand < 2:
            continue                                   # keep grid >= 2
        best = cand
    if best is None:
        # bt == B => grid == 1 => full-array block is always layout-legal.
        best = 1 if S % 8 == 0 else B
    return best


def _estimate_vmem_bytes(N, BT, S, E, H, cbytes, single_buffer_consts):
    """Rough per-grid-step VMEM footprint (used to set vmem_limit_bytes)."""
    f32 = 4
    wbuf = 1 if single_buffer_consts else 2
    weights = 12 * E * E * cbytes * wbuf
    small = 16 * E * f32 * wbuf                        # LN params + biases
    io = 2 * (N * E * f32) * 2                         # x + out blocks, dbl-buffered
    live = (3 * E + 4 * E + 6 * E) * N * f32           # qkv, h1, xn/x1/x2/attn, ...
    attn = (2 * BT * S * S + 3 * BT * S * (E // H)) * f32
    return weights + small + io + live + attn


def block_forward(x_sbe, params, num_heads, *, compute_dtype=jnp.bfloat16,
                  batch_tile=None, approx_softmax=None):
    """x_sbe: (S, B, E) float32, PyTorch nn.MultiheadAttention layout.

    compute_dtype=bfloat16 (default) feeds bf16 operands to the MXU with f32
    accumulation — the recommended production setting on v6e/v7x; pass
    float32 for bit-accurate parity testing (as done in __main__).
    """
    S, B, E = x_sbe.shape
    assert E % num_heads == 0
    cdt = jnp.dtype(compute_dtype)
    if approx_softmax is None:
        approx_softmax = (cdt != jnp.dtype(jnp.float32))

    try:
        phys_vmem = int(pltpu.get_tpu_info().vmem_capacity_bytes)
    except Exception:                                  # conservative: v7x size
        phys_vmem = 64 * 1024 * 1024

    if batch_tile is None:
        batch_tile = _pick_batch_tile(B, S, E, num_heads, cdt.itemsize, phys_vmem)
    assert B % batch_tile == 0
    BT = batch_tile
    N = BT * S
    grid = (B // BT,)
    if B // BT > 1:
        assert N % 8 == 0, "batch_tile * seq must be a multiple of 8 when grid > 1"

    # (S, B, E) -> (B*S, E): batch folded into matmul rows, lane-dense last dim.
    x2d = jnp.transpose(x_sbe, (1, 0, 2)).reshape(B * S, E)

    # Fold 1/sqrt(Dh) into the Q columns of the fused in-projection (wrapper-side).
    scale = 1.0 / math.sqrt(E // num_heads)
    w_in = params["w_in"].at[:, :E].multiply(scale).astype(cdt)
    b_in = params["b_in"].at[:, :E].multiply(scale)

    flat_inputs = (x2d,
                   params["ln1_g"], params["ln1_b"],
                   w_in, b_in,
                   params["w_out"].astype(cdt), params["b_out"],
                   params["ln2_g"], params["ln2_b"],
                   params["w1"].astype(cdt), params["b1"],
                   params["w2"].astype(cdt), params["b2"])

    est = _estimate_vmem_bytes(N, BT, S, E, num_heads, cdt.itemsize,
                               single_buffer_consts=False)   # worst case
    vmem_limit = int(min(max(est * 1.4, 32 * 1024 * 1024),
                         int(phys_vmem * 0.9)))

    kernel = functools.partial(_block_kernel, num_heads=num_heads,
                               seq_len=S, approx_recip=approx_softmax)

    def _call(single_buffer_consts):
        def const_spec(shape):
            nd = len(shape)
            idx = lambda i, _n=nd: (0,) * _n
            if single_buffer_consts:
                # Constants never change across the grid: one buffer is enough.
                return pl.BlockSpec(shape, idx, pipeline_mode=pl.Buffered(1))
            return pl.BlockSpec(shape, idx)

        in_specs = ([pl.BlockSpec((N, E), lambda i: (i, 0))]
                    + [const_spec(a.shape) for a in flat_inputs[1:]])

        return pl.pallas_call(
            kernel,
            out_shape=jax.ShapeDtypeStruct((B * S, E), x_sbe.dtype),
            grid_spec=pltpu.PrefetchScalarGridSpec(
                num_scalar_prefetch=0,
                grid=grid,
                in_specs=in_specs,
                out_specs=pl.BlockSpec((N, E), lambda i: (i, 0))),
            compiler_params=pltpu.CompilerParams(
                dimension_semantics=("parallel",),
                vmem_limit_bytes=vmem_limit),
        )(*flat_inputs)

    try:
        out2d = _call(True)       # single-buffer the constant weight blocks
    except Exception:
        out2d = _call(False)      # runtime without pl.Buffered(1) support

    return jnp.transpose(out2d.reshape(B, S, E), (1, 0, 2))   # back to (S, B, E)


def ref_forward(x_sbe, p, num_heads):
    """Pure-JAX reference mirroring PyTorch _Block.forward semantics."""
    S, B, E = x_sbe.shape
    Dh = E // num_heads

    def ln(v, g, b):
        mu = v.mean(-1, keepdims=True)
        var = ((v - mu) ** 2).mean(-1, keepdims=True)
        return (v - mu) / jnp.sqrt(var + 1e-5) * g + b

    x = jnp.transpose(x_sbe, (1, 0, 2))                # (B, S, E)
    xn = ln(x, p["ln1_g"], p["ln1_b"])
    qkv = xn @ p["w_in"] + p["b_in"]
    q, k, v = qkv[..., :E], qkv[..., E:2 * E], qkv[..., 2 * E:]
    q = q.reshape(B, S, num_heads, Dh).transpose(0, 2, 1, 3)
    k = k.reshape(B, S, num_heads, Dh).transpose(0, 2, 1, 3)
    v = v.reshape(B, S, num_heads, Dh).transpose(0, 2, 1, 3)
    s = jnp.einsum("bhqd,bhkd->bhqk", q, k) / math.sqrt(Dh)
    mask = jnp.where(jnp.arange(S)[None, :] > jnp.arange(S)[:, None],
                     -jnp.inf, 0.0)
    s = s + mask
    w = jax.nn.softmax(s, axis=-1)
    a = jnp.einsum("bhqk,bhkd->bhqd", w, v).transpose(0, 2, 1, 3).reshape(B, S, E)
    a = a @ p["w_out"] + p["b_out"]
    x1 = xn + a
    x2 = ln(x1, p["ln2_g"], p["ln2_b"])
    h = x2 @ p["w1"] + p["b1"]
    h = 0.5 * h * (1.0 + jax.lax.erf(h / math.sqrt(2.0)))
    m = h @ p["w2"] + p["b2"]
    return jnp.transpose(x1 + m, (1, 0, 2))


def make_params(key, embed_dim):
    E = embed_dim
    ks = jax.random.split(key, 8)
    scale = 0.02
    # Weights stored pre-transposed (in_features, out_features) so the kernel
    # uses plain x @ W; PyTorch stores (out, in).
    return {
        "ln1_g": jnp.ones((1, E), jnp.float32),
        "ln1_b": jnp.zeros((1, E), jnp.float32),
        "w_in": scale * jax.random.normal(ks[0], (E, 3 * E), jnp.float32),
        "b_in": scale * jax.random.normal(ks[1], (1, 3 * E), jnp.float32),
        "w_out": scale * jax.random.normal(ks[2], (E, E), jnp.float32),
        "b_out": scale * jax.random.normal(ks[3], (1, E), jnp.float32),
        "ln2_g": jnp.ones((1, E), jnp.float32),
        "ln2_b": jnp.zeros((1, E), jnp.float32),
        "w1": scale * jax.random.normal(ks[4], (E, 4 * E), jnp.float32),
        "b1": scale * jax.random.normal(ks[5], (1, 4 * E), jnp.float32),
        "w2": scale * jax.random.normal(ks[6], (4 * E, E), jnp.float32),
        "b2": scale * jax.random.normal(ks[7], (1, E), jnp.float32),
    }


if __name__ == "__main__":
    S, B, E, H = 8, 2, 32, 4            # seq, batch, embed_dim, num_heads
    key = jax.random.PRNGKey(0)
    kx, kp = jax.random.split(key)
    x = jax.random.normal(kx, (S, B, E), jnp.float32)   # PyTorch layout (S, B, E)
    params = make_params(kp, E)

    # f32 compute path (exact softmax reciprocal) for parity with the f32
    # reference; the default compute_dtype=bfloat16 is the production setting.
    out = block_forward(x, params, H, compute_dtype=jnp.float32)
    out = jax.block_until_ready(out)

    ref = ref_forward(x, params, H)
    assert out.shape == (S, B, E)
    assert jnp.allclose(out, ref, atol=5e-4, rtol=5e-4), "mismatch vs JAX reference"
    print("KERNEL_OK")
</pallas_src>

<mosaic_0001>
module attributes {stable_mosaic.version = 11 : i64} {
  func.func @_block_kernel(%arg0: i32, %arg1: memref<8x32xf32, #tpu.memory_space<vmem>>, %arg2: memref<1x32xf32, #tpu.memory_space<vmem>>, %arg3: memref<1x32xf32, #tpu.memory_space<vmem>>, %arg4: memref<32x96xf32, #tpu.memory_space<vmem>>, %arg5: memref<1x96xf32, #tpu.memory_space<vmem>>, %arg6: memref<32x32xf32, #tpu.memory_space<vmem>>, %arg7: memref<1x32xf32, #tpu.memory_space<vmem>>, %arg8: memref<1x32xf32, #tpu.memory_space<vmem>>, %arg9: memref<1x32xf32, #tpu.memory_space<vmem>>, %arg10: memref<32x128xf32, #tpu.memory_space<vmem>>, %arg11: memref<1x128xf32, #tpu.memory_space<vmem>>, %arg12: memref<128x32xf32, #tpu.memory_space<vmem>>, %arg13: memref<1x32xf32, #tpu.memory_space<vmem>>, %arg14: memref<8x32xf32, #tpu.memory_space<vmem>>) attributes {dimension_semantics = [#tpu.dimension_semantics<parallel>], iteration_bounds = array<i64: 2>, scalar_prefetch = 0 : i64, scratch_operands = 0 : i64, tpu.core_type = #tpu.core_type<tc>, window_params = [{transform_indices = @transform_0, window_bounds = array<i64: 8, 32>}, {pipeline_mode = #tpu.pipeline_mode<synchronous>, transform_indices = @transform_1, window_bounds = array<i64: 1, 32>}, {pipeline_mode = #tpu.pipeline_mode<synchronous>, transform_indices = @transform_2, window_bounds = array<i64: 1, 32>}, {pipeline_mode = #tpu.pipeline_mode<synchronous>, transform_indices = @transform_3, window_bounds = array<i64: 32, 96>}, {pipeline_mode = #tpu.pipeline_mode<synchronous>, transform_indices = @transform_4, window_bounds = array<i64: 1, 96>}, {pipeline_mode = #tpu.pipeline_mode<synchronous>, transform_indices = @transform_5, window_bounds = array<i64: 32, 32>}, {pipeline_mode = #tpu.pipeline_mode<synchronous>, transform_indices = @transform_6, window_bounds = array<i64: 1, 32>}, {pipeline_mode = #tpu.pipeline_mode<synchronous>, transform_indices = @transform_7, window_bounds = array<i64: 1, 32>}, {pipeline_mode = #tpu.pipeline_mode<synchronous>, transform_indices = @transform_8, window_bounds = array<i64: 1, 32>}, {pipeline_mode = #tpu.pipeline_mode<synchronous>, transform_indices = @transform_9, window_bounds = array<i64: 32, 128>}, {pipeline_mode = #tpu.pipeline_mode<synchronous>, transform_indices = @transform_10, window_bounds = array<i64: 1, 128>}, {pipeline_mode = #tpu.pipeline_mode<synchronous>, transform_indices = @transform_11, window_bounds = array<i64: 128, 32>}, {pipeline_mode = #tpu.pipeline_mode<synchronous>, transform_indices = @transform_12, window_bounds = array<i64: 1, 32>}, {transform_indices = @transform_13, window_bounds = array<i64: 8, 32>}]} {
    %c0 = arith.constant 0 : index
    %c0_0 = arith.constant 0 : index
    %0 = vector.load %arg1[%c0, %c0_0] : memref<8x32xf32, #tpu.memory_space<vmem>>, vector<8x32xf32>
    %c0_1 = arith.constant 0 : index
    %c0_2 = arith.constant 0 : index
    %1 = vector.load %arg2[%c0_1, %c0_2] : memref<1x32xf32, #tpu.memory_space<vmem>>, vector<1x32xf32>
    %c0_3 = arith.constant 0 : index
    %c0_4 = arith.constant 0 : index
    %2 = vector.load %arg3[%c0_3, %c0_4] : memref<1x32xf32, #tpu.memory_space<vmem>>, vector<1x32xf32>
    %cst = arith.constant dense<0.000000e+00> : vector<8xf32>
    %3 = vector.multi_reduction <add>, %0, %cst [1] : vector<8x32xf32> to vector<8xf32>
    %4 = vector.shape_cast %3 : vector<8xf32> to vector<8x1xf32>
    %cst_5 = arith.constant 3.200000e+01 : f32
    %5 = vector.broadcast %cst_5 : f32 to vector<8x1xf32>
    %6 = arith.divf %4, %5 : vector<8x1xf32>
    %7 = arith.mulf %0, %0 : vector<8x32xf32>
    %cst_6 = arith.constant dense<0.000000e+00> : vector<8xf32>
    %8 = vector.multi_reduction <add>, %7, %cst_6 [1] : vector<8x32xf32> to vector<8xf32>
    %9 = vector.shape_cast %8 : vector<8xf32> to vector<8x1xf32>
    %cst_7 = arith.constant 3.200000e+01 : f32
    %10 = vector.broadcast %cst_7 : f32 to vector<8x1xf32>
    %11 = arith.divf %9, %10 : vector<8x1xf32>
    %12 = arith.mulf %6, %6 : vector<8x1xf32>
    %13 = arith.subf %11, %12 : vector<8x1xf32>
    %14 = vector.broadcast %6 : vector<8x1xf32> to vector<8x32xf32>
    %15 = arith.subf %0, %14 : vector<8x32xf32>
    %cst_8 = arith.constant 9.99999974E-6 : f32
    %16 = vector.broadcast %cst_8 : f32 to vector<8x1xf32>
    %17 = arith.addf %13, %16 : vector<8x1xf32>
    %18 = math.rsqrt %17 : vector<8x1xf32>
    %19 = vector.broadcast %18 : vector<8x1xf32> to vector<8x32xf32>
    %20 = arith.mulf %15, %19 : vector<8x32xf32>
    %21 = vector.broadcast %1 : vector<1x32xf32> to vector<8x32xf32>
    %22 = arith.mulf %20, %21 : vector<8x32xf32>
    %23 = vector.broadcast %2 : vector<1x32xf32> to vector<8x32xf32>
    %24 = arith.addf %22, %23 : vector<8x32xf32>
    %c0_9 = arith.constant 0 : index
    %c0_10 = arith.constant 0 : index
    %25 = vector.load %arg4[%c0_9, %c0_10] : memref<32x96xf32, #tpu.memory_space<vmem>>, vector<32x96xf32>
    %cst_11 = arith.constant dense<0.000000e+00> : vector<8x96xf32>
    %26 = tpu.matmul %24, %25, %cst_11 {dimension_numbers = #tpu.dot_dimension_numbers<[1], [0], [0], [1], [0, 0, 1, 1], [], []>} : vector<8x32xf32>, vector<32x96xf32>, vector<8x96xf32> -> vector<8x96xf32>
    %c0_12 = arith.constant 0 : index
    %c0_13 = arith.constant 0 : index
    %27 = vector.load %arg5[%c0_12, %c0_13] : memref<1x96xf32, #tpu.memory_space<vmem>>, vector<1x96xf32>
    %28 = vector.broadcast %27 : vector<1x96xf32> to vector<8x96xf32>
    %29 = arith.addf %26, %28 : vector<8x96xf32>
    %30 = vector.extract_strided_slice %29 {offsets = [0, 0], sizes = [8, 32], strides = [1, 1]} : vector<8x96xf32> to vector<8x32xf32>
    %31 = vector.extract_strided_slice %29 {offsets = [0, 32], sizes = [8, 32], strides = [1, 1]} : vector<8x96xf32> to vector<8x32xf32>
    %32 = vector.extract_strided_slice %29 {offsets = [0, 64], sizes = [8, 32], strides = [1, 1]} : vector<8x96xf32> to vector<8x32xf32>
    %33 = tpu.iota {dimensions = array<i32: 0>} : vector<8x8xi32>
    %34 = tpu.iota {dimensions = array<i32: 1>} : vector<8x8xi32>
    %35 = arith.cmpi sle, %34, %33 : vector<8x8xi32>
    %36 = vector.shape_cast %35 : vector<8x8xi1> to vector<1x8x8xi1>
    %cst_14 = arith.constant 0.000000e+00 : f32
    %37 = vector.broadcast %cst_14 : f32 to vector<8x32xf32>
    %38 = vector.extract_strided_slice %30 {offsets = [0, 0], sizes = [8, 8], strides = [1, 1]} : vector<8x32xf32> to vector<8x8xf32>
    %39 = vector.shape_cast %38 : vector<8x8xf32> to vector<1x8x8xf32>
    %40 = vector.extract_strided_slice %31 {offsets = [0, 0], sizes = [8, 8], strides = [1, 1]} : vector<8x32xf32> to vector<8x8xf32>
    %41 = vector.shape_cast %40 : vector<8x8xf32> to vector<1x8x8xf32>
    %42 = vector.extract_strided_slice %32 {offsets = [0, 0], sizes = [8, 8], strides = [1, 1]} : vector<8x32xf32> to vector<8x8xf32>
    %43 = vector.shape_cast %42 : vector<8x8xf32> to vector<1x8x8xf32>
    "tpu.trace_start"() <{level = 10 : i32, message = "bqd,bkd->bqk"}> : () -> ()
    %cst_15 = arith.constant dense<0.000000e+00> : vector<1x8x8xf32>
    %44 = tpu.matmul %39, %41, %cst_15 {dimension_numbers = #tpu.dot_dimension_numbers<[2], [2], [1], [1], [0, 0, 0, 1, 1, 1], [0], [0]>} : vector<1x8x8xf32>, vector<1x8x8xf32>, vector<1x8x8xf32> -> vector<1x8x8xf32>
    %cst_16 = arith.constant 0xFF800000 : f32
    "tpu.trace_stop"() : () -> ()
    %45 = vector.broadcast %cst_16 : f32 to vector<1x8x8xf32>
    %46 = arith.select %36, %44, %45 : vector<1x8x8xi1>, vector<1x8x8xf32>
    %cst_17 = arith.constant dense<0xFF800000> : vector<1x8xf32>
    %47 = vector.multi_reduction <maximumf>, %46, %cst_17 [2] : vector<1x8x8xf32> to vector<1x8xf32>
    %48 = vector.shape_cast %47 : vector<1x8xf32> to vector<1x8x1xf32>
    %49 = vector.broadcast %48 : vector<1x8x1xf32> to vector<1x8x8xf32>
    %50 = arith.subf %46, %49 : vector<1x8x8xf32>
    %51 = math.exp %50 : vector<1x8x8xf32>
    %cst_18 = arith.constant dense<0.000000e+00> : vector<1x8xf32>
    %52 = vector.multi_reduction <add>, %51, %cst_18 [2] : vector<1x8x8xf32> to vector<1x8xf32>
    %53 = vector.shape_cast %52 : vector<1x8xf32> to vector<1x8x1xf32>
    %54 = tpu.reciprocal %53 : vector<1x8x1xf32> -> vector<1x8x1xf32>
    %55 = vector.broadcast %54 : vector<1x8x1xf32> to vector<1x8x8xf32>
    %56 = arith.mulf %51, %55 : vector<1x8x8xf32>
    "tpu.trace_start"() <{level = 10 : i32, message = "bqk,bkd->bqd"}> : () -> ()
    %cst_19 = arith.constant dense<0.000000e+00> : vector<1x8x8xf32>
    %57 = tpu.matmul %56, %43, %cst_19 {dimension_numbers = #tpu.dot_dimension_numbers<[2], [1], [1], [2], [0, 0, 0, 1, 1, 2], [0], [0]>} : vector<1x8x8xf32>, vector<1x8x8xf32>, vector<1x8x8xf32> -> vector<1x8x8xf32>
    "tpu.trace_stop"() : () -> ()
    %58 = vector.shape_cast %57 : vector<1x8x8xf32> to vector<8x8xf32>
    %c0_20 = arith.constant 0 : index
    %c0_21 = arith.constant 0 : index
    %59 = vector.load %arg6[%c0_20, %c0_21] : memref<32x32xf32, #tpu.memory_space<vmem>>, vector<8x32xf32>
    %cst_22 = arith.constant dense<0.000000e+00> : vector<8x32xf32>
    %60 = tpu.matmul %58, %59, %cst_22 {dimension_numbers = #tpu.dot_dimension_numbers<[1], [0], [0], [1], [0, 0, 1, 1], [], []>} : vector<8x8xf32>, vector<8x32xf32>, vector<8x32xf32> -> vector<8x32xf32>
    %61 = arith.addf %37, %60 : vector<8x32xf32>
    %62 = vector.extract_strided_slice %30 {offsets = [0, 8], sizes = [8, 8], strides = [1, 1]} : vector<8x32xf32> to vector<8x8xf32>
    %63 = vector.shape_cast %62 : vector<8x8xf32> to vector<1x8x8xf32>
    %64 = vector.extract_strided_slice %31 {offsets = [0, 8], sizes = [8, 8], strides = [1, 1]} : vector<8x32xf32> to vector<8x8xf32>
    %65 = vector.shape_cast %64 : vector<8x8xf32> to vector<1x8x8xf32>
    %66 = vector.extract_strided_slice %32 {offsets = [0, 8], sizes = [8, 8], strides = [1, 1]} : vector<8x32xf32> to vector<8x8xf32>
    %67 = vector.shape_cast %66 : vector<8x8xf32> to vector<1x8x8xf32>
    "tpu.trace_start"() <{level = 10 : i32, message = "bqd,bkd->bqk"}> : () -> ()
    %cst_23 = arith.constant dense<0.000000e+00> : vector<1x8x8xf32>
    %68 = tpu.matmul %63, %65, %cst_23 {dimension_numbers = #tpu.dot_dimension_numbers<[2], [2], [1], [1], [0, 0, 0, 1, 1, 1], [0], [0]>} : vector<1x8x8xf32>, vector<1x8x8xf32>, vector<1x8x8xf32> -> vector<1x8x8xf32>
    %cst_24 = arith.constant 0xFF800000 : f32
    "tpu.trace_stop"() : () -> ()
    %69 = vector.broadcast %cst_24 : f32 to vector<1x8x8xf32>
    %70 = arith.select %36, %68, %69 : vector<1x8x8xi1>, vector<1x8x8xf32>
    %cst_25 = arith.constant dense<0xFF800000> : vector<1x8xf32>
    %71 = vector.multi_reduction <maximumf>, %70, %cst_25 [2] : vector<1x8x8xf32> to vector<1x8xf32>
    %72 = vector.shape_cast %71 : vector<1x8xf32> to vector<1x8x1xf32>
    %73 = vector.broadcast %72 : vector<1x8x1xf32> to vector<1x8x8xf32>
    %74 = arith.subf %70, %73 : vector<1x8x8xf32>
    %75 = math.exp %74 : vector<1x8x8xf32>
    %cst_26 = arith.constant dense<0.000000e+00> : vector<1x8xf32>
    %76 = vector.multi_reduction <add>, %75, %cst_26 [2] : vector<1x8x8xf32> to vector<1x8xf32>
    %77 = vector.shape_cast %76 : vector<1x8xf32> to vector<1x8x1xf32>
    %78 = tpu.reciprocal %77 : vector<1x8x1xf32> -> vector<1x8x1xf32>
    %79 = vector.broadcast %78 : vector<1x8x1xf32> to vector<1x8x8xf32>
    %80 = arith.mulf %75, %79 : vector<1x8x8xf32>
    "tpu.trace_start"() <{level = 10 : i32, message = "bqk,bkd->bqd"}> : () -> ()
    %cst_27 = arith.constant dense<0.000000e+00> : vector<1x8x8xf32>
    %81 = tpu.matmul %80, %67, %cst_27 {dimension_numbers = #tpu.dot_dimension_numbers<[2], [1], [1], [2], [0, 0, 0, 1, 1, 2], [0], [0]>} : vector<1x8x8xf32>, vector<1x8x8xf32>, vector<1x8x8xf32> -> vector<1x8x8xf32>
    "tpu.trace_stop"() : () -> ()
    %82 = vector.shape_cast %81 : vector<1x8x8xf32> to vector<8x8xf32>
    %c8 = arith.constant 8 : index
    %c0_28 = arith.constant 0 : index
    %83 = vector.load %arg6[%c8, %c0_28] : memref<32x32xf32, #tpu.memory_space<vmem>>, vector<8x32xf32>
    %cst_29 = arith.constant dense<0.000000e+00> : vector<8x32xf32>
    %84 = tpu.matmul %82, %83, %cst_29 {dimension_numbers = #tpu.dot_dimension_numbers<[1], [0], [0], [1], [0, 0, 1, 1], [], []>} : vector<8x8xf32>, vector<8x32xf32>, vector<8x32xf32> -> vector<8x32xf32>
    %85 = arith.addf %61, %84 : vector<8x32xf32>
    %86 = vector.extract_strided_slice %30 {offsets = [0, 16], sizes = [8, 8], strides = [1, 1]} : vector<8x32xf32> to vector<8x8xf32>
    %87 = vector.shape_cast %86 : vector<8x8xf32> to vector<1x8x8xf32>
    %88 = vector.extract_strided_slice %31 {offsets = [0, 16], sizes = [8, 8], strides = [1, 1]} : vector<8x32xf32> to vector<8x8xf32>
    %89 = vector.shape_cast %88 : vector<8x8xf32> to vector<1x8x8xf32>
    %90 = vector.extract_strided_slice %32 {offsets = [0, 16], sizes = [8, 8], strides = [1, 1]} : vector<8x32xf32> to vector<8x8xf32>
    %91 = vector.shape_cast %90 : vector<8x8xf32> to vector<1x8x8xf32>
    "tpu.trace_start"() <{level = 10 : i32, message = "bqd,bkd->bqk"}> : () -> ()
    %cst_30 = arith.constant dense<0.000000e+00> : vector<1x8x8xf32>
    %92 = tpu.matmul %87, %89, %cst_30 {dimension_numbers = #tpu.dot_dimension_numbers<[2], [2], [1], [1], [0, 0, 0, 1, 1, 1], [0], [0]>} : vector<1x8x8xf32>, vector<1x8x8xf32>, vector<1x8x8xf32> -> vector<1x8x8xf32>
    %cst_31 = arith.constant 0xFF800000 : f32
    "tpu.trace_stop"() : () -> ()
    %93 = vector.broadcast %cst_31 : f32 to vector<1x8x8xf32>
    %94 = arith.select %36, %92, %93 : vector<1x8x8xi1>, vector<1x8x8xf32>
    %cst_32 = arith.constant dense<0xFF800000> : vector<1x8xf32>
    %95 = vector.multi_reduction <maximumf>, %94, %cst_32 [2] : vector<1x8x8xf32> to vector<1x8xf32>
    %96 = vector.shape_cast %95 : vector<1x8xf32> to vector<1x8x1xf32>
    %97 = vector.broadcast %96 : vector<1x8x1xf32> to vector<1x8x8xf32>
    %98 = arith.subf %94, %97 : vector<1x8x8xf32>
    %99 = math.exp %98 : vector<1x8x8xf32>
    %cst_33 = arith.constant dense<0.000000e+00> : vector<1x8xf32>
    %100 = vector.multi_reduction <add>, %99, %cst_33 [2] : vector<1x8x8xf32> to vector<1x8xf32>
    %101 = vector.shape_cast %100 : vector<1x8xf32> to vector<1x8x1xf32>
    %102 = tpu.reciprocal %101 : vector<1x8x1xf32> -> vector<1x8x1xf32>
    %103 = vector.broadcast %102 : vector<1x8x1xf32> to vector<1x8x8xf32>
    %104 = arith.mulf %99, %103 : vector<1x8x8xf32>
    "tpu.trace_start"() <{level = 10 : i32, message = "bqk,bkd->bqd"}> : () -> ()
    %cst_34 = arith.constant dense<0.000000e+00> : vector<1x8x8xf32>
    %105 = tpu.matmul %104, %91, %cst_34 {dimension_numbers = #tpu.dot_dimension_numbers<[2], [1], [1], [2], [0, 0, 0, 1, 1, 2], [0], [0]>} : vector<1x8x8xf32>, vector<1x8x8xf32>, vector<1x8x8xf32> -> vector<1x8x8xf32>
    "tpu.trace_stop"() : () -> ()
    %106 = vector.shape_cast %105 : vector<1x8x8xf32> to vector<8x8xf32>
    %c16 = arith.constant 16 : index
    %c0_35 = arith.constant 0 : index
    %107 = vector.load %arg6[%c16, %c0_35] : memref<32x32xf32, #tpu.memory_space<vmem>>, vector<8x32xf32>
    %cst_36 = arith.constant dense<0.000000e+00> : vector<8x32xf32>
    %108 = tpu.matmul %106, %107, %cst_36 {dimension_numbers = #tpu.dot_dimension_numbers<[1], [0], [0], [1], [0, 0, 1, 1], [], []>} : vector<8x8xf32>, vector<8x32xf32>, vector<8x32xf32> -> vector<8x32xf32>
    %109 = arith.addf %85, %108 : vector<8x32xf32>
    %110 = vector.extract_strided_slice %30 {offsets = [0, 24], sizes = [8, 8], strides = [1, 1]} : vector<8x32xf32> to vector<8x8xf32>
    %111 = vector.shape_cast %110 : vector<8x8xf32> to vector<1x8x8xf32>
    %112 = vector.extract_strided_slice %31 {offsets = [0, 24], sizes = [8, 8], strides = [1, 1]} : vector<8x32xf32> to vector<8x8xf32>
    %113 = vector.shape_cast %112 : vector<8x8xf32> to vector<1x8x8xf32>
    %114 = vector.extract_strided_slice %32 {offsets = [0, 24], sizes = [8, 8], strides = [1, 1]} : vector<8x32xf32> to vector<8x8xf32>
    %115 = vector.shape_cast %114 : vector<8x8xf32> to vector<1x8x8xf32>
    "tpu.trace_start"() <{level = 10 : i32, message = "bqd,bkd->bqk"}> : () -> ()
    %cst_37 = arith.constant dense<0.000000e+00> : vector<1x8x8xf32>
    %116 = tpu.matmul %111, %113, %cst_37 {dimension_numbers = #tpu.dot_dimension_numbers<[2], [2], [1], [1], [0, 0, 0, 1, 1, 1], [0], [0]>} : vector<1x8x8xf32>, vector<1x8x8xf32>, vector<1x8x8xf32> -> vector<1x8x8xf32>
    %cst_38 = arith.constant 0xFF800000 : f32
    "tpu.trace_stop"() : () -> ()
    %117 = vector.broadcast %cst_38 : f32 to vector<1x8x8xf32>
    %118 = arith.select %36, %116, %117 : vector<1x8x8xi1>, vector<1x8x8xf32>
    %cst_39 = arith.constant dense<0xFF800000> : vector<1x8xf32>
    %119 = vector.multi_reduction <maximumf>, %118, %cst_39 [2] : vector<1x8x8xf32> to vector<1x8xf32>
    %120 = vector.shape_cast %119 : vector<1x8xf32> to vector<1x8x1xf32>
    %121 = vector.broadcast %120 : vector<1x8x1xf32> to vector<1x8x8xf32>
    %122 = arith.subf %118, %121 : vector<1x8x8xf32>
    %123 = math.exp %122 : vector<1x8x8xf32>
    %cst_40 = arith.constant dense<0.000000e+00> : vector<1x8xf32>
    %124 = vector.multi_reduction <add>, %123, %cst_40 [2] : vector<1x8x8xf32> to vector<1x8xf32>
    %125 = vector.shape_cast %124 : vector<1x8xf32> to vector<1x8x1xf32>
    %126 = tpu.reciprocal %125 : vector<1x8x1xf32> -> vector<1x8x1xf32>
    %127 = vector.broadcast %126 : vector<1x8x1xf32> to vector<1x8x8xf32>
    %128 = arith.mulf %123, %127 : vector<1x8x8xf32>
    "tpu.trace_start"() <{level = 10 : i32, message = "bqk,bkd->bqd"}> : () -> ()
    %cst_41 = arith.constant dense<0.000000e+00> : vector<1x8x8xf32>
    %129 = tpu.matmul %128, %115, %cst_41 {dimension_numbers = #tpu.dot_dimension_numbers<[2], [1], [1], [2], [0, 0, 0, 1, 1, 2], [0], [0]>} : vector<1x8x8xf32>, vector<1x8x8xf32>, vector<1x8x8xf32> -> vector<1x8x8xf32>
    "tpu.trace_stop"() : () -> ()
    %130 = vector.shape_cast %129 : vector<1x8x8xf32> to vector<8x8xf32>
    %c24 = arith.constant 24 : index
    %c0_42 = arith.constant 0 : index
    %131 = vector.load %arg6[%c24, %c0_42] : memref<32x32xf32, #tpu.memory_space<vmem>>, vector<8x32xf32>
    %cst_43 = arith.constant dense<0.000000e+00> : vector<8x32xf32>
    %132 = tpu.matmul %130, %131, %cst_43 {dimension_numbers = #tpu.dot_dimension_numbers<[1], [0], [0], [1], [0, 0, 1, 1], [], []>} : vector<8x8xf32>, vector<8x32xf32>, vector<8x32xf32> -> vector<8x32xf32>
    %133 = arith.addf %109, %132 : vector<8x32xf32>
    %134 = arith.addf %24, %133 : vector<8x32xf32>
    %c0_44 = arith.constant 0 : index
    %c0_45 = arith.constant 0 : index
    %135 = vector.load %arg7[%c0_44, %c0_45] : memref<1x32xf32, #tpu.memory_space<vmem>>, vector<1x32xf32>
    %136 = vector.broadcast %135 : vector<1x32xf32> to vector<8x32xf32>
    %137 = arith.addf %134, %136 : vector<8x32xf32>
    %c0_46 = arith.constant 0 : index
    %c0_47 = arith.constant 0 : index
    %138 = vector.load %arg8[%c0_46, %c0_47] : memref<1x32xf32, #tpu.memory_space<vmem>>, vector<1x32xf32>
    %c0_48 = arith.constant 0 : index
    %c0_49 = arith.constant 0 : index
    %139 = vector.load %arg9[%c0_48, %c0_49] : memref<1x32xf32, #tpu.memory_space<vmem>>, vector<1x32xf32>
    %cst_50 = arith.constant dense<0.000000e+00> : vector<8xf32>
    %140 = vector.multi_reduction <add>, %137, %cst_50 [1] : vector<8x32xf32> to vector<8xf32>
    %141 = vector.shape_cast %140 : vector<8xf32> to vector<8x1xf32>
    %cst_51 = arith.constant 3.200000e+01 : f32
    %142 = vector.broadcast %cst_51 : f32 to vector<8x1xf32>
    %143 = arith.divf %141, %142 : vector<8x1xf32>
    %144 = arith.mulf %137, %137 : vector<8x32xf32>
    %cst_52 = arith.constant dense<0.000000e+00> : vector<8xf32>
    %145 = vector.multi_reduction <add>, %144, %cst_52 [1] : vector<8x32xf32> to vector<8xf32>
    %146 = vector.shape_cast %145 : vector<8xf32> to vector<8x1xf32>
    %cst_53 = arith.constant 3.200000e+01 : f32
    %147 = vector.broadcast %cst_53 : f32 to vector<8x1xf32>
    %148 = arith.divf %146, %147 : vector<8x1xf32>
    %149 = arith.mulf %143, %143 : vector<8x1xf32>
    %150 = arith.subf %148, %149 : vector<8x1xf32>
    %151 = vector.broadcast %143 : vector<8x1xf32> to vector<8x32xf32>
    %152 = arith.subf %137, %151 : vector<8x32xf32>
    %cst_54 = arith.constant 9.99999974E-6 : f32
    %153 = vector.broadcast %cst_54 : f32 to vector<8x1xf32>
    %154 = arith.addf %150, %153 : vector<8x1xf32>
    %155 = math.rsqrt %154 : vector<8x1xf32>
    %156 = vector.broadcast %155 : vector<8x1xf32> to vector<8x32xf32>
    %157 = arith.mulf %152, %156 : vector<8x32xf32>
    %158 = vector.broadcast %138 : vector<1x32xf32> to vector<8x32xf32>
    %159 = arith.mulf %157, %158 : vector<8x32xf32>
    %160 = vector.broadcast %139 : vector<1x32xf32> to vector<8x32xf32>
    %161 = arith.addf %159, %160 : vector<8x32xf32>
    %c0_55 = arith.constant 0 : index
    %c0_56 = arith.constant 0 : index
    %162 = vector.load %arg10[%c0_55, %c0_56] : memref<32x128xf32, #tpu.memory_space<vmem>>, vector<32x128xf32>
    %cst_57 = arith.constant dense<0.000000e+00> : vector<8x128xf32>
    %163 = tpu.matmul %161, %162, %cst_57 {dimension_numbers = #tpu.dot_dimension_numbers<[1], [0], [0], [1], [0, 0, 1, 1], [], []>} : vector<8x32xf32>, vector<32x128xf32>, vector<8x128xf32> -> vector<8x128xf32>
    %c0_58 = arith.constant 0 : index
    %c0_59 = arith.constant 0 : index
    %164 = vector.load %arg11[%c0_58, %c0_59] : memref<1x128xf32, #tpu.memory_space<vmem>>, vector<1x128xf32>
    %165 = vector.broadcast %164 : vector<1x128xf32> to vector<8x128xf32>
    %166 = arith.addf %163, %165 : vector<8x128xf32>
    %cst_60 = arith.constant 5.000000e-01 : f32
    %167 = vector.broadcast %cst_60 : f32 to vector<8x128xf32>
    %168 = arith.mulf %167, %166 : vector<8x128xf32>
    %cst_61 = arith.constant 0.707106769 : f32
    %169 = vector.broadcast %cst_61 : f32 to vector<8x128xf32>
    %170 = arith.mulf %166, %169 : vector<8x128xf32>
    %171 = math.erf %170 : vector<8x128xf32>
    %cst_62 = arith.constant 1.000000e+00 : f32
    %172 = vector.broadcast %cst_62 : f32 to vector<8x128xf32>
    %173 = arith.addf %172, %171 : vector<8x128xf32>
    %174 = arith.mulf %168, %173 : vector<8x128xf32>
    %c0_63 = arith.constant 0 : index
    %c0_64 = arith.constant 0 : index
    %175 = vector.load %arg12[%c0_63, %c0_64] : memref<128x32xf32, #tpu.memory_space<vmem>>, vector<128x32xf32>
    %cst_65 = arith.constant dense<0.000000e+00> : vector<8x32xf32>
    %176 = tpu.matmul %174, %175, %cst_65 {dimension_numbers = #tpu.dot_dimension_numbers<[1], [0], [0], [1], [0, 0, 1, 1], [], []>} : vector<8x128xf32>, vector<128x32xf32>, vector<8x32xf32> -> vector<8x32xf32>
    %c0_66 = arith.constant 0 : index
    %c0_67 = arith.constant 0 : index
    %177 = vector.load %arg13[%c0_66, %c0_67] : memref<1x32xf32, #tpu.memory_space<vmem>>, vector<1x32xf32>
    %178 = vector.broadcast %177 : vector<1x32xf32> to vector<8x32xf32>
    %179 = arith.addf %176, %178 : vector<8x32xf32>
    %180 = arith.addf %137, %179 : vector<8x32xf32>
    %c0_68 = arith.constant 0 : index
    %c0_69 = arith.constant 0 : index
    %181 = vector.load %arg14[%c0_68, %c0_69] : memref<8x32xf32, #tpu.memory_space<vmem>>, vector<8x32xf32>
    tpu.vector_store %arg14[%c0_68, %c0_69], %180 {strides = array<i32>} : memref<8x32xf32, #tpu.memory_space<vmem>>, vector<8x32xf32>,
    return
  }
  func.func @transform_0(%arg0: i32) -> (i32, i32) {
    %c0_i32 = arith.constant 0 : i32
    %c0_i32_0 = arith.constant 0 : i32
    return %arg0, %c0_i32 : i32, i32
  }
  func.func @transform_1(%arg0: i32) -> (i32, i32) {
    %c0_i32 = arith.constant 0 : i32
    %c0_i32_0 = arith.constant 0 : i32
    %c0_i32_1 = arith.constant 0 : i32
    return %c0_i32, %c0_i32_0 : i32, i32
  }
  func.func @transform_2(%arg0: i32) -> (i32, i32) {
    %c0_i32 = arith.constant 0 : i32
    %c0_i32_0 = arith.constant 0 : i32
    %c0_i32_1 = arith.constant 0 : i32
    return %c0_i32, %c0_i32_0 : i32, i32
  }
  func.func @transform_3(%arg0: i32) -> (i32, i32) {
    %c0_i32 = arith.constant 0 : i32
    %c0_i32_0 = arith.constant 0 : i32
    %c0_i32_1 = arith.constant 0 : i32
    return %c0_i32, %c0_i32_0 : i32, i32
  }
  func.func @transform_4(%arg0: i32) -> (i32, i32) {
    %c0_i32 = arith.constant 0 : i32
    %c0_i32_0 = arith.constant 0 : i32
    %c0_i32_1 = arith.constant 0 : i32
    return %c0_i32, %c0_i32_0 : i32, i32
  }
  func.func @transform_5(%arg0: i32) -> (i32, i32) {
    %c0_i32 = arith.constant 0 : i32
    %c0_i32_0 = arith.constant 0 : i32
    %c0_i32_1 = arith.constant 0 : i32
    return %c0_i32, %c0_i32_0 : i32, i32
  }
  func.func @transform_6(%arg0: i32) -> (i32, i32) {
    %c0_i32 = arith.constant 0 : i32
    %c0_i32_0 = arith.constant 0 : i32
    %c0_i32_1 = arith.constant 0 : i32
    return %c0_i32, %c0_i32_0 : i32, i32
  }
  func.func @transform_7(%arg0: i32) -> (i32, i32) {
    %c0_i32 = arith.constant 0 : i32
    %c0_i32_0 = arith.constant 0 : i32
    %c0_i32_1 = arith.constant 0 : i32
    return %c0_i32, %c0_i32_0 : i32, i32
  }
  func.func @transform_8(%arg0: i32) -> (i32, i32) {
    %c0_i32 = arith.constant 0 : i32
    %c0_i32_0 = arith.constant 0 : i32
    %c0_i32_1 = arith.constant 0 : i32
    return %c0_i32, %c0_i32_0 : i32, i32
  }
  func.func @transform_9(%arg0: i32) -> (i32, i32) {
    %c0_i32 = arith.constant 0 : i32
    %c0_i32_0 = arith.constant 0 : i32
    %c0_i32_1 = arith.constant 0 : i32
    return %c0_i32, %c0_i32_0 : i32, i32
  }
  func.func @transform_10(%arg0: i32) -> (i32, i32) {
    %c0_i32 = arith.constant 0 : i32
    %c0_i32_0 = arith.constant 0 : i32
    %c0_i32_1 = arith.constant 0 : i32
    return %c0_i32, %c0_i32_0 : i32, i32
  }
  func.func @transform_11(%arg0: i32) -> (i32, i32) {
    %c0_i32 = arith.constant 0 : i32
    %c0_i32_0 = arith.constant 0 : i32
    %c0_i32_1 = arith.constant 0 : i32
    return %c0_i32, %c0_i32_0 : i32, i32
  }
  func.func @transform_12(%arg0: i32) -> (i32, i32) {
    %c0_i32 = arith.constant 0 : i32
    %c0_i32_0 = arith.constant 0 : i32
    %c0_i32_1 = arith.constant 0 : i32
    return %c0_i32, %c0_i32_0 : i32, i32
  }
  func.func @transform_13(%arg0: i32) -> (i32, i32) {
    %c0_i32 = arith.constant 0 : i32
    %c0_i32_0 = arith.constant 0 : i32
    return %arg0, %c0_i32 : i32, i32
  }
}

module attributes {stable_mosaic.version = 11 : i64} {
  func.func @_block_kernel(%arg0: i32, %arg1: memref<8x32xf32, #tpu.memory_space<vmem>>, %arg2: memref<1x32xf32, #tpu.memory_space<vmem>>, %arg3: memref<1x32xf32, #tpu.memory_space<vmem>>, %arg4: memref<32x96xf32, #tpu.memory_space<vmem>>, %arg5: memref<1x96xf32, #tpu.memory_space<vmem>>, %arg6: memref<32x32xf32, #tpu.memory_space<vmem>>, %arg7: memref<1x32xf32, #tpu.memory_space<vmem>>, %arg8: memref<1x32xf32, #tpu.memory_space<vmem>>, %arg9: memref<1x32xf32, #tpu.memory_space<vmem>>, %arg10: memref<32x128xf32, #tpu.memory_space<vmem>>, %arg11: memref<1x128xf32, #tpu.memory_space<vmem>>, %arg12: memref<128x32xf32, #tpu.memory_space<vmem>>, %arg13: memref<1x32xf32, #tpu.memory_space<vmem>>, %arg14: memref<8x32xf32, #tpu.memory_space<vmem>>) attributes {dimension_semantics = [#tpu.dimension_semantics<parallel>], iteration_bounds = array<i64: 2>, scalar_prefetch = 0 : i64, scratch_operands = 0 : i64, tpu.core_type = #tpu.core_type<tc>, window_params = [{transform_indices = @transform_0, window_bounds = array<i64: 8, 32>}, {pipeline_mode = #tpu.pipeline_mode<synchronous>, transform_indices = @transform_1, window_bounds = array<i64: 1, 32>}, {pipeline_mode = #tpu.pipeline_mode<synchronous>, transform_indices = @transform_2, window_bounds = array<i64: 1, 32>}, {pipeline_mode = #tpu.pipeline_mode<synchronous>, transform_indices = @transform_3, window_bounds = array<i64: 32, 96>}, {pipeline_mode = #tpu.pipeline_mode<synchronous>, transform_indices = @transform_4, window_bounds = array<i64: 1, 96>}, {pipeline_mode = #tpu.pipeline_mode<synchronous>, transform_indices = @transform_5, window_bounds = array<i64: 32, 32>}, {pipeline_mode = #tpu.pipeline_mode<synchronous>, transform_indices = @transform_6, window_bounds = array<i64: 1, 32>}, {pipeline_mode = #tpu.pipeline_mode<synchronous>, transform_indices = @transform_7, window_bounds = array<i64: 1, 32>}, {pipeline_mode = #tpu.pipeline_mode<synchronous>, transform_indices = @transform_8, window_bounds = array<i64: 1, 32>}, {pipeline_mode = #tpu.pipeline_mode<synchronous>, transform_indices = @transform_9, window_bounds = array<i64: 32, 128>}, {pipeline_mode = #tpu.pipeline_mode<synchronous>, transform_indices = @transform_10, window_bounds = array<i64: 1, 128>}, {pipeline_mode = #tpu.pipeline_mode<synchronous>, transform_indices = @transform_11, window_bounds = array<i64: 128, 32>}, {pipeline_mode = #tpu.pipeline_mode<synchronous>, transform_indices = @transform_12, window_bounds = array<i64: 1, 32>}, {transform_indices = @transform_13, window_bounds = array<i64: 8, 32>}]} {
    %c0 = arith.constant 0 : index
    %c0_0 = arith.constant 0 : index
    %0 = vector.load %arg1[%c0, %c0_0] : memref<8x32xf32, #tpu.memory_space<vmem>>, vector<8x32xf32>
    %c0_1 = arith.constant 0 : index
    %c0_2 = arith.constant 0 : index
    %1 = vector.load %arg2[%c0_1, %c0_2] : memref<1x32xf32, #tpu.memory_space<vmem>>, vector<1x32xf32>
    %c0_3 = arith.constant 0 : index
    %c0_4 = arith.constant 0 : index
    %2 = vector.load %arg3[%c0_3, %c0_4] : memref<1x32xf32, #tpu.memory_space<vmem>>, vector<1x32xf32>
    %cst = arith.constant dense<0.000000e+00> : vector<8xf32>
    %3 = vector.multi_reduction <add>, %0, %cst [1] : vector<8x32xf32> to vector<8xf32>
    %4 = vector.shape_cast %3 : vector<8xf32> to vector<8x1xf32>
    %cst_5 = arith.constant 3.200000e+01 : f32
    %5 = vector.broadcast %cst_5 : f32 to vector<8x1xf32>
    %6 = arith.divf %4, %5 : vector<8x1xf32>
    %7 = arith.mulf %0, %0 : vector<8x32xf32>
    %cst_6 = arith.constant dense<0.000000e+00> : vector<8xf32>
    %8 = vector.multi_reduction <add>, %7, %cst_6 [1] : vector<8x32xf32> to vector<8xf32>
    %9 = vector.shape_cast %8 : vector<8xf32> to vector<8x1xf32>
    %cst_7 = arith.constant 3.200000e+01 : f32
    %10 = vector.broadcast %cst_7 : f32 to vector<8x1xf32>
    %11 = arith.divf %9, %10 : vector<8x1xf32>
    %12 = arith.mulf %6, %6 : vector<8x1xf32>
    %13 = arith.subf %11, %12 : vector<8x1xf32>
    %14 = vector.broadcast %6 : vector<8x1xf32> to vector<8x32xf32>
    %15 = arith.subf %0, %14 : vector<8x32xf32>
    %cst_8 = arith.constant 9.99999974E-6 : f32
    %16 = vector.broadcast %cst_8 : f32 to vector<8x1xf32>
    %17 = arith.addf %13, %16 : vector<8x1xf32>
    %18 = math.rsqrt %17 : vector<8x1xf32>
    %19 = vector.broadcast %18 : vector<8x1xf32> to vector<8x32xf32>
    %20 = arith.mulf %15, %19 : vector<8x32xf32>
    %21 = vector.broadcast %1 : vector<1x32xf32> to vector<8x32xf32>
    %22 = arith.mulf %20, %21 : vector<8x32xf32>
    %23 = vector.broadcast %2 : vector<1x32xf32> to vector<8x32xf32>
    %24 = arith.addf %22, %23 : vector<8x32xf32>
    %c0_9 = arith.constant 0 : index
    %c0_10 = arith.constant 0 : index
    %25 = vector.load %arg4[%c0_9, %c0_10] : memref<32x96xf32, #tpu.memory_space<vmem>>, vector<32x96xf32>
    %cst_11 = arith.constant dense<0.000000e+00> : vector<8x96xf32>
    %26 = tpu.matmul %24, %25, %cst_11 {dimension_numbers = #tpu.dot_dimension_numbers<[1], [0], [0], [1], [0, 0, 1, 1], [], []>} : vector<8x32xf32>, vector<32x96xf32>, vector<8x96xf32> -> vector<8x96xf32>
    %c0_12 = arith.constant 0 : index
    %c0_13 = arith.constant 0 : index
    %27 = vector.load %arg5[%c0_12, %c0_13] : memref<1x96xf32, #tpu.memory_space<vmem>>, vector<1x96xf32>
    %28 = vector.broadcast %27 : vector<1x96xf32> to vector<8x96xf32>
    %29 = arith.addf %26, %28 : vector<8x96xf32>
    %30 = vector.extract_strided_slice %29 {offsets = [0, 0], sizes = [8, 32], strides = [1, 1]} : vector<8x96xf32> to vector<8x32xf32>
    %31 = vector.extract_strided_slice %29 {offsets = [0, 32], sizes = [8, 32], strides = [1, 1]} : vector<8x96xf32> to vector<8x32xf32>
    %32 = vector.extract_strided_slice %29 {offsets = [0, 64], sizes = [8, 32], strides = [1, 1]} : vector<8x96xf32> to vector<8x32xf32>
    %33 = tpu.iota {dimensions = array<i32: 0>} : vector<8x8xi32>
    %34 = tpu.iota {dimensions = array<i32: 1>} : vector<8x8xi32>
    %35 = arith.cmpi sle, %34, %33 : vector<8x8xi32>
    %36 = vector.shape_cast %35 : vector<8x8xi1> to vector<1x8x8xi1>
    %cst_14 = arith.constant 0.000000e+00 : f32
    %37 = vector.broadcast %cst_14 : f32 to vector<8x32xf32>
    %38 = vector.extract_strided_slice %30 {offsets = [0, 0], sizes = [8, 8], strides = [1, 1]} : vector<8x32xf32> to vector<8x8xf32>
    %39 = vector.shape_cast %38 : vector<8x8xf32> to vector<1x8x8xf32>
    %40 = vector.extract_strided_slice %31 {offsets = [0, 0], sizes = [8, 8], strides = [1, 1]} : vector<8x32xf32> to vector<8x8xf32>
    %41 = vector.shape_cast %40 : vector<8x8xf32> to vector<1x8x8xf32>
    %42 = vector.extract_strided_slice %32 {offsets = [0, 0], sizes = [8, 8], strides = [1, 1]} : vector<8x32xf32> to vector<8x8xf32>
    %43 = vector.shape_cast %42 : vector<8x8xf32> to vector<1x8x8xf32>
    "tpu.trace_start"() <{level = 10 : i32, message = "bqd,bkd->bqk"}> : () -> ()
    %cst_15 = arith.constant dense<0.000000e+00> : vector<1x8x8xf32>
    %44 = tpu.matmul %39, %41, %cst_15 {dimension_numbers = #tpu.dot_dimension_numbers<[2], [2], [1], [1], [0, 0, 0, 1, 1, 1], [0], [0]>} : vector<1x8x8xf32>, vector<1x8x8xf32>, vector<1x8x8xf32> -> vector<1x8x8xf32>
    %cst_16 = arith.constant 0xFF800000 : f32
    "tpu.trace_stop"() : () -> ()
    %45 = vector.broadcast %cst_16 : f32 to vector<1x8x8xf32>
    %46 = arith.select %36, %44, %45 : vector<1x8x8xi1>, vector<1x8x8xf32>
    %cst_17 = arith.constant dense<0xFF800000> : vector<1x8xf32>
    %47 = vector.multi_reduction <maximumf>, %46, %cst_17 [2] : vector<1x8x8xf32> to vector<1x8xf32>
    %48 = vector.shape_cast %47 : vector<1x8xf32> to vector<1x8x1xf32>
    %49 = vector.broadcast %48 : vector<1x8x1xf32> to vector<1x8x8xf32>
    %50 = arith.subf %46, %49 : vector<1x8x8xf32>
    %51 = math.exp %50 : vector<1x8x8xf32>
    %cst_18 = arith.constant dense<0.000000e+00> : vector<1x8xf32>
    %52 = vector.multi_reduction <add>, %51, %cst_18 [2] : vector<1x8x8xf32> to vector<1x8xf32>
    %53 = vector.shape_cast %52 : vector<1x8xf32> to vector<1x8x1xf32>
    %54 = tpu.reciprocal %53 : vector<1x8x1xf32> -> vector<1x8x1xf32>
    %55 = vector.broadcast %54 : vector<1x8x1xf32> to vector<1x8x8xf32>
    %56 = arith.mulf %51, %55 : vector<1x8x8xf32>
    "tpu.trace_start"() <{level = 10 : i32, message = "bqk,bkd->bqd"}> : () -> ()
    %cst_19 = arith.constant dense<0.000000e+00> : vector<1x8x8xf32>
    %57 = tpu.matmul %56, %43, %cst_19 {dimension_numbers = #tpu.dot_dimension_numbers<[2], [1], [1], [2], [0, 0, 0, 1, 1, 2], [0], [0]>} : vector<1x8x8xf32>, vector<1x8x8xf32>, vector<1x8x8xf32> -> vector<1x8x8xf32>
    "tpu.trace_stop"() : () -> ()
    %58 = vector.shape_cast %57 : vector<1x8x8xf32> to vector<8x8xf32>
    %c0_20 = arith.constant 0 : index
    %c0_21 = arith.constant 0 : index
    %59 = vector.load %arg6[%c0_20, %c0_21] : memref<32x32xf32, #tpu.memory_space<vmem>>, vector<8x32xf32>
    %cst_22 = arith.constant dense<0.000000e+00> : vector<8x32xf32>
    %60 = tpu.matmul %58, %59, %cst_22 {dimension_numbers = #tpu.dot_dimension_numbers<[1], [0], [0], [1], [0, 0, 1, 1], [], []>} : vector<8x8xf32>, vector<8x32xf32>, vector<8x32xf32> -> vector<8x32xf32>
    %61 = arith.addf %37, %60 : vector<8x32xf32>
    %62 = vector.extract_strided_slice %30 {offsets = [0, 8], sizes = [8, 8], strides = [1, 1]} : vector<8x32xf32> to vector<8x8xf32>
    %63 = vector.shape_cast %62 : vector<8x8xf32> to vector<1x8x8xf32>
    %64 = vector.extract_strided_slice %31 {offsets = [0, 8], sizes = [8, 8], strides = [1, 1]} : vector<8x32xf32> to vector<8x8xf32>
    %65 = vector.shape_cast %64 : vector<8x8xf32> to vector<1x8x8xf32>
    %66 = vector.extract_strided_slice %32 {offsets = [0, 8], sizes = [8, 8], strides = [1, 1]} : vector<8x32xf32> to vector<8x8xf32>
    %67 = vector.shape_cast %66 : vector<8x8xf32> to vector<1x8x8xf32>
    "tpu.trace_start"() <{level = 10 : i32, message = "bqd,bkd->bqk"}> : () -> ()
    %cst_23 = arith.constant dense<0.000000e+00> : vector<1x8x8xf32>
    %68 = tpu.matmul %63, %65, %cst_23 {dimension_numbers = #tpu.dot_dimension_numbers<[2], [2], [1], [1], [0, 0, 0, 1, 1, 1], [0], [0]>} : vector<1x8x8xf32>, vector<1x8x8xf32>, vector<1x8x8xf32> -> vector<1x8x8xf32>
    %cst_24 = arith.constant 0xFF800000 : f32
    "tpu.trace_stop"() : () -> ()
    %69 = vector.broadcast %cst_24 : f32 to vector<1x8x8xf32>
    %70 = arith.select %36, %68, %69 : vector<1x8x8xi1>, vector<1x8x8xf32>
    %cst_25 = arith.constant dense<0xFF800000> : vector<1x8xf32>
    %71 = vector.multi_reduction <maximumf>, %70, %cst_25 [2] : vector<1x8x8xf32> to vector<1x8xf32>
    %72 = vector.shape_cast %71 : vector<1x8xf32> to vector<1x8x1xf32>
    %73 = vector.broadcast %72 : vector<1x8x1xf32> to vector<1x8x8xf32>
    %74 = arith.subf %70, %73 : vector<1x8x8xf32>
    %75 = math.exp %74 : vector<1x8x8xf32>
    %cst_26 = arith.constant dense<0.000000e+00> : vector<1x8xf32>
    %76 = vector.multi_reduction <add>, %75, %cst_26 [2] : vector<1x8x8xf32> to vector<1x8xf32>
    %77 = vector.shape_cast %76 : vector<1x8xf32> to vector<1x8x1xf32>
    %78 = tpu.reciprocal %77 : vector<1x8x1xf32> -> vector<1x8x1xf32>
    %79 = vector.broadcast %78 : vector<1x8x1xf32> to vector<1x8x8xf32>
    %80 = arith.mulf %75, %79 : vector<1x8x8xf32>
    "tpu.trace_start"() <{level = 10 : i32, message = "bqk,bkd->bqd"}> : () -> ()
    %cst_27 = arith.constant dense<0.000000e+00> : vector<1x8x8xf32>
    %81 = tpu.matmul %80, %67, %cst_27 {dimension_numbers = #tpu.dot_dimension_numbers<[2], [1], [1], [2], [0, 0, 0, 1, 1, 2], [0], [0]>} : vector<1x8x8xf32>, vector<1x8x8xf32>, vector<1x8x8xf32> -> vector<1x8x8xf32>
    "tpu.trace_stop"() : () -> ()
    %82 = vector.shape_cast %81 : vector<1x8x8xf32> to vector<8x8xf32>
    %c8 = arith.constant 8 : index
    %c0_28 = arith.constant 0 : index
    %83 = vector.load %arg6[%c8, %c0_28] : memref<32x32xf32, #tpu.memory_space<vmem>>, vector<8x32xf32>
    %cst_29 = arith.constant dense<0.000000e+00> : vector<8x32xf32>
    %84 = tpu.matmul %82, %83, %cst_29 {dimension_numbers = #tpu.dot_dimension_numbers<[1], [0], [0], [1], [0, 0, 1, 1], [], []>} : vector<8x8xf32>, vector<8x32xf32>, vector<8x32xf32> -> vector<8x32xf32>
    %85 = arith.addf %61, %84 : vector<8x32xf32>
    %86 = vector.extract_strided_slice %30 {offsets = [0, 16], sizes = [8, 8], strides = [1, 1]} : vector<8x32xf32> to vector<8x8xf32>
    %87 = vector.shape_cast %86 : vector<8x8xf32> to vector<1x8x8xf32>
    %88 = vector.extract_strided_slice %31 {offsets = [0, 16], sizes = [8, 8], strides = [1, 1]} : vector<8x32xf32> to vector<8x8xf32>
    %89 = vector.shape_cast %88 : vector<8x8xf32> to vector<1x8x8xf32>
    %90 = vector.extract_strided_slice %32 {offsets = [0, 16], sizes = [8, 8], strides = [1, 1]} : vector<8x32xf32> to vector<8x8xf32>
    %91 = vector.shape_cast %90 : vector<8x8xf32> to vector<1x8x8xf32>
    "tpu.trace_start"() <{level = 10 : i32, message = "bqd,bkd->bqk"}> : () -> ()
    %cst_30 = arith.constant dense<0.000000e+00> : vector<1x8x8xf32>
    %92 = tpu.matmul %87, %89, %cst_30 {dimension_numbers = #tpu.dot_dimension_numbers<[2], [2], [1], [1], [0, 0, 0, 1, 1, 1], [0], [0]>} : vector<1x8x8xf32>, vector<1x8x8xf32>, vector<1x8x8xf32> -> vector<1x8x8xf32>
    %cst_31 = arith.constant 0xFF800000 : f32
    "tpu.trace_stop"() : () -> ()
    %93 = vector.broadcast %cst_31 : f32 to vector<1x8x8xf32>
    %94 = arith.select %36, %92, %93 : vector<1x8x8xi1>, vector<1x8x8xf32>
    %cst_32 = arith.constant dense<0xFF800000> : vector<1x8xf32>
    %95 = vector.multi_reduction <maximumf>, %94, %cst_32 [2] : vector<1x8x8xf32> to vector<1x8xf32>
    %96 = vector.shape_cast %95 : vector<1x8xf32> to vector<1x8x1xf32>
    %97 = vector.broadcast %96 : vector<1x8x1xf32> to vector<1x8x8xf32>
    %98 = arith.subf %94, %97 : vector<1x8x8xf32>
    %99 = math.exp %98 : vector<1x8x8xf32>
    %cst_33 = arith.constant dense<0.000000e+00> : vector<1x8xf32>
    %100 = vector.multi_reduction <add>, %99, %cst_33 [2] : vector<1x8x8xf32> to vector<1x8xf32>
    %101 = vector.shape_cast %100 : vector<1x8xf32> to vector<1x8x1xf32>
    %102 = tpu.reciprocal %101 : vector<1x8x1xf32> -> vector<1x8x1xf32>
    %103 = vector.broadcast %102 : vector<1x8x1xf32> to vector<1x8x8xf32>
    %104 = arith.mulf %99, %103 : vector<1x8x8xf32>
    "tpu.trace_start"() <{level = 10 : i32, message = "bqk,bkd->bqd"}> : () -> ()
    %cst_34 = arith.constant dense<0.000000e+00> : vector<1x8x8xf32>
    %105 = tpu.matmul %104, %91, %cst_34 {dimension_numbers = #tpu.dot_dimension_numbers<[2], [1], [1], [2], [0, 0, 0, 1, 1, 2], [0], [0]>} : vector<1x8x8xf32>, vector<1x8x8xf32>, vector<1x8x8xf32> -> vector<1x8x8xf32>
    "tpu.trace_stop"() : () -> ()
    %106 = vector.shape_cast %105 : vector<1x8x8xf32> to vector<8x8xf32>
    %c16 = arith.constant 16 : index
    %c0_35 = arith.constant 0 : index
    %107 = vector.load %arg6[%c16, %c0_35] : memref<32x32xf32, #tpu.memory_space<vmem>>, vector<8x32xf32>
    %cst_36 = arith.constant dense<0.000000e+00> : vector<8x32xf32>
    %108 = tpu.matmul %106, %107, %cst_36 {dimension_numbers = #tpu.dot_dimension_numbers<[1], [0], [0], [1], [0, 0, 1, 1], [], []>} : vector<8x8xf32>, vector<8x32xf32>, vector<8x32xf32> -> vector<8x32xf32>
    %109 = arith.addf %85, %108 : vector<8x32xf32>
    %110 = vector.extract_strided_slice %30 {offsets = [0, 24], sizes = [8, 8], strides = [1, 1]} : vector<8x32xf32> to vector<8x8xf32>
    %111 = vector.shape_cast %110 : vector<8x8xf32> to vector<1x8x8xf32>
    %112 = vector.extract_strided_slice %31 {offsets = [0, 24], sizes = [8, 8], strides = [1, 1]} : vector<8x32xf32> to vector<8x8xf32>
    %113 = vector.shape_cast %112 : vector<8x8xf32> to vector<1x8x8xf32>
    %114 = vector.extract_strided_slice %32 {offsets = [0, 24], sizes = [8, 8], strides = [1, 1]} : vector<8x32xf32> to vector<8x8xf32>
    %115 = vector.shape_cast %114 : vector<8x8xf32> to vector<1x8x8xf32>
    "tpu.trace_start"() <{level = 10 : i32, message = "bqd,bkd->bqk"}> : () -> ()
    %cst_37 = arith.constant dense<0.000000e+00> : vector<1x8x8xf32>
    %116 = tpu.matmul %111, %113, %cst_37 {dimension_numbers = #tpu.dot_dimension_numbers<[2], [2], [1], [1], [0, 0, 0, 1, 1, 1], [0], [0]>} : vector<1x8x8xf32>, vector<1x8x8xf32>, vector<1x8x8xf32> -> vector<1x8x8xf32>
    %cst_38 = arith.constant 0xFF800000 : f32
    "tpu.trace_stop"() : () -> ()
    %117 = vector.broadcast %cst_38 : f32 to vector<1x8x8xf32>
    %118 = arith.select %36, %116, %117 : vector<1x8x8xi1>, vector<1x8x8xf32>
    %cst_39 = arith.constant dense<0xFF800000> : vector<1x8xf32>
    %119 = vector.multi_reduction <maximumf>, %118, %cst_39 [2] : vector<1x8x8xf32> to vector<1x8xf32>
    %120 = vector.shape_cast %119 : vector<1x8xf32> to vector<1x8x1xf32>
    %121 = vector.broadcast %120 : vector<1x8x1xf32> to vector<1x8x8xf32>
    %122 = arith.subf %118, %121 : vector<1x8x8xf32>
    %123 = math.exp %122 : vector<1x8x8xf32>
    %cst_40 = arith.constant dense<0.000000e+00> : vector<1x8xf32>
    %124 = vector.multi_reduction <add>, %123, %cst_40 [2] : vector<1x8x8xf32> to vector<1x8xf32>
    %125 = vector.shape_cast %124 : vector<1x8xf32> to vector<1x8x1xf32>
    %126 = tpu.reciprocal %125 : vector<1x8x1xf32> -> vector<1x8x1xf32>
    %127 = vector.broadcast %126 : vector<1x8x1xf32> to vector<1x8x8xf32>
    %128 = arith.mulf %123, %127 : vector<1x8x8xf32>
    "tpu.trace_start"() <{level = 10 : i32, message = "bqk,bkd->bqd"}> : () -> ()
    %cst_41 = arith.constant dense<0.000000e+00> : vector<1x8x8xf32>
    %129 = tpu.matmul %128, %115, %cst_41 {dimension_numbers = #tpu.dot_dimension_numbers<[2], [1], [1], [2], [0, 0, 0, 1, 1, 2], [0], [0]>} : vector<1x8x8xf32>, vector<1x8x8xf32>, vector<1x8x8xf32> -> vector<1x8x8xf32>
    "tpu.trace_stop"() : () -> ()
    %130 = vector.shape_cast %129 : vector<1x8x8xf32> to vector<8x8xf32>
    %c24 = arith.constant 24 : index
    %c0_42 = arith.constant 0 : index
    %131 = vector.load %arg6[%c24, %c0_42] : memref<32x32xf32, #tpu.memory_space<vmem>>, vector<8x32xf32>
    %cst_43 = arith.constant dense<0.000000e+00> : vector<8x32xf32>
    %132 = tpu.matmul %130, %131, %cst_43 {dimension_numbers = #tpu.dot_dimension_numbers<[1], [0], [0], [1], [0, 0, 1, 1], [], []>} : vector<8x8xf32>, vector<8x32xf32>, vector<8x32xf32> -> vector<8x32xf32>
    %133 = arith.addf %109, %132 : vector<8x32xf32>
    %134 = arith.addf %24, %133 : vector<8x32xf32>
    %c0_44 = arith.constant 0 : index
    %c0_45 = arith.constant 0 : index
    %135 = vector.load %arg7[%c0_44, %c0_45] : memref<1x32xf32, #tpu.memory_space<vmem>>, vector<1x32xf32>
    %136 = vector.broadcast %135 : vector<1x32xf32> to vector<8x32xf32>
    %137 = arith.addf %134, %136 : vector<8x32xf32>
    %c0_46 = arith.constant 0 : index
    %c0_47 = arith.constant 0 : index
    %138 = vector.load %arg8[%c0_46, %c0_47] : memref<1x32xf32, #tpu.memory_space<vmem>>, vector<1x32xf32>
    %c0_48 = arith.constant 0 : index
    %c0_49 = arith.constant 0 : index
    %139 = vector.load %arg9[%c0_48, %c0_49] : memref<1x32xf32, #tpu.memory_space<vmem>>, vector<1x32xf32>
    %cst_50 = arith.constant dense<0.000000e+00> : vector<8xf32>
    %140 = vector.multi_reduction <add>, %137, %cst_50 [1] : vector<8x32xf32> to vector<8xf32>
    %141 = vector.shape_cast %140 : vector<8xf32> to vector<8x1xf32>
    %cst_51 = arith.constant 3.200000e+01 : f32
    %142 = vector.broadcast %cst_51 : f32 to vector<8x1xf32>
    %143 = arith.divf %141, %142 : vector<8x1xf32>
    %144 = arith.mulf %137, %137 : vector<8x32xf32>
    %cst_52 = arith.constant dense<0.000000e+00> : vector<8xf32>
    %145 = vector.multi_reduction <add>, %144, %cst_52 [1] : vector<8x32xf32> to vector<8xf32>
    %146 = vector.shape_cast %145 : vector<8xf32> to vector<8x1xf32>
    %cst_53 = arith.constant 3.200000e+01 : f32
    %147 = vector.broadcast %cst_53 : f32 to vector<8x1xf32>
    %148 = arith.divf %146, %147 : vector<8x1xf32>
    %149 = arith.mulf %143, %143 : vector<8x1xf32>
    %150 = arith.subf %148, %149 : vector<8x1xf32>
    %151 = vector.broadcast %143 : vector<8x1xf32> to vector<8x32xf32>
    %152 = arith.subf %137, %151 : vector<8x32xf32>
    %cst_54 = arith.constant 9.99999974E-6 : f32
    %153 = vector.broadcast %cst_54 : f32 to vector<8x1xf32>
    %154 = arith.addf %150, %153 : vector<8x1xf32>
    %155 = math.rsqrt %154 : vector<8x1xf32>
    %156 = vector.broadcast %155 : vector<8x1xf32> to vector<8x32xf32>
    %157 = arith.mulf %152, %156 : vector<8x32xf32>
    %158 = vector.broadcast %138 : vector<1x32xf32> to vector<8x32xf32>
    %159 = arith.mulf %157, %158 : vector<8x32xf32>
    %160 = vector.broadcast %139 : vector<1x32xf32> to vector<8x32xf32>
    %161 = arith.addf %159, %160 : vector<8x32xf32>
    %c0_55 = arith.constant 0 : index
    %c0_56 = arith.constant 0 : index
    %162 = vector.load %arg10[%c0_55, %c0_56] : memref<32x128xf32, #tpu.memory_space<vmem>>, vector<32x128xf32>
    %cst_57 = arith.constant dense<0.000000e+00> : vector<8x128xf32>
    %163 = tpu.matmul %161, %162, %cst_57 {dimension_numbers = #tpu.dot_dimension_numbers<[1], [0], [0], [1], [0, 0, 1, 1], [], []>} : vector<8x32xf32>, vector<32x128xf32>, vector<8x128xf32> -> vector<8x128xf32>
    %c0_58 = arith.constant 0 : index
    %c0_59 = arith.constant 0 : index
    %164 = vector.load %arg11[%c0_58, %c0_59] : memref<1x128xf32, #tpu.memory_space<vmem>>, vector<1x128xf32>
    %165 = vector.broadcast %164 : vector<1x128xf32> to vector<8x128xf32>
    %166 = arith.addf %163, %165 : vector<8x128xf32>
    %cst_60 = arith.constant 5.000000e-01 : f32
    %167 = vector.broadcast %cst_60 : f32 to vector<8x128xf32>
    %168 = arith.mulf %167, %166 : vector<8x128xf32>
    %cst_61 = arith.constant 0.707106769 : f32
    %169 = vector.broadcast %cst_61 : f32 to vector<8x128xf32>
    %170 = arith.mulf %166, %169 : vector<8x128xf32>
    %171 = math.erf %170 : vector<8x128xf32>
    %cst_62 = arith.constant 1.000000e+00 : f32
    %172 = vector.broadcast %cst_62 : f32 to vector<8x128xf32>
    %173 = arith.addf %172, %171 : vector<8x128xf32>
    %174 = arith.mulf %168, %173 : vector<8x128xf32>
    %c0_63 = arith.constant 0 : index
    %c0_64 = arith.constant 0 : index
    %175 = vector.load %arg12[%c0_63, %c0_64] : memref<128x32xf32, #tpu.memory_space<vmem>>, vector<128x32xf32>
    %cst_65 = arith.constant dense<0.000000e+00> : vector<8x32xf32>
    %176 = tpu.matmul %174, %175, %cst_65 {dimension_numbers = #tpu.dot_dimension_numbers<[1], [0], [0], [1], [0, 0, 1, 1], [], []>} : vector<8x128xf32>, vector<128x32xf32>, vector<8x32xf32> -> vector<8x32xf32>
    %c0_66 = arith.constant 0 : index
    %c0_67 = arith.constant 0 : index
    %177 = vector.load %arg13[%c0_66, %c0_67] : memref<1x32xf32, #tpu.memory_space<vmem>>, vector<1x32xf32>
    %178 = vector.broadcast %177 : vector<1x32xf32> to vector<8x32xf32>
    %179 = arith.addf %176, %178 : vector<8x32xf32>
    %180 = arith.addf %137, %179 : vector<8x32xf32>
    %c0_68 = arith.constant 0 : index
    %c0_69 = arith.constant 0 : index
    %181 = vector.load %arg14[%c0_68, %c0_69] : memref<8x32xf32, #tpu.memory_space<vmem>>, vector<8x32xf32>
    tpu.vector_store %arg14[%c0_68, %c0_69], %180 {strides = array<i32>} : memref<8x32xf32, #tpu.memory_space<vmem>>, vector<8x32xf32>,
    return
  }
  func.func @transform_0(%arg0: i32) -> (i32, i32) {
    %c0_i32 = arith.constant 0 : i32
    %c0_i32_0 = arith.constant 0 : i32
    return %arg0, %c0_i32 : i32, i32
  }
  func.func @transform_1(%arg0: i32) -> (i32, i32) {
    %c0_i32 = arith.constant 0 : i32
    %c0_i32_0 = arith.constant 0 : i32
    %c0_i32_1 = arith.constant 0 : i32
    return %c0_i32, %c0_i32_0 : i32, i32
  }
  func.func @transform_2(%arg0: i32) -> (i32, i32) {
    %c0_i32 = arith.constant 0 : i32
    %c0_i32_0 = arith.constant 0 : i32
    %c0_i32_1 = arith.constant 0 : i32
    return %c0_i32, %c0_i32_0 : i32, i32
  }
  func.func @transform_3(%arg0: i32) -> (i32, i32) {
    %c0_i32 = arith.constant 0 : i32
    %c0_i32_0 = arith.constant 0 : i32
    %c0_i32_1 = arith.constant 0 : i32
    return %c0_i32, %c0_i32_0 : i32, i32
  }
  func.func @transform_4(%arg0: i32) -> (i32, i32) {
    %c0_i32 = arith.constant 0 : i32
    %c0_i32_0 = arith.constant 0 : i32
    %c0_i32_1 = arith.constant 0 : i32
    return %c0_i32, %c0_i32_0 : i32, i32
  }
  func.func @transform_5(%arg0: i32) -> (i32, i32) {
    %c0_i32 = arith.constant 0 : i32
    %c0_i32_0 = arith.constant 0 : i32
    %c0_i32_1 = arith.constant 0 : i32
    return %c0_i32, %c0_i32_0 : i32, i32
  }
  func.func @transform_6(%arg0: i32) -> (i32, i32) {
    %c0_i32 = arith.constant 0 : i32
    %c0_i32_0 = arith.constant 0 : i32
    %c0_i32_1 = arith.constant 0 : i32
    return %c0_i32, %c0_i32_0 : i32, i32
  }
  func.func @transform_7(%arg0: i32) -> (i32, i32) {
    %c0_i32 = arith.constant 0 : i32
    %c0_i32_0 = arith.constant 0 : i32
    %c0_i32_1 = arith.constant 0 : i32
    return %c0_i32, %c0_i32_0 : i32, i32
  }
  func.func @transform_8(%arg0: i32) -> (i32, i32) {
    %c0_i32 = arith.constant 0 : i32
    %c0_i32_0 = arith.constant 0 : i32
    %c0_i32_1 = arith.constant 0 : i32
    return %c0_i32, %c0_i32_0 : i32, i32
  }
  func.func @transform_9(%arg0: i32) -> (i32, i32) {
    %c0_i32 = arith.constant 0 : i32
    %c0_i32_0 = arith.constant 0 : i32
    %c0_i32_1 = arith.constant 0 : i32
    return %c0_i32, %c0_i32_0 : i32, i32
  }
  func.func @transform_10(%arg0: i32) -> (i32, i32) {
    %c0_i32 = arith.constant 0 : i32
    %c0_i32_0 = arith.constant 0 : i32
    %c0_i32_1 = arith.constant 0 : i32
    return %c0_i32, %c0_i32_0 : i32, i32
  }
  func.func @transform_11(%arg0: i32) -> (i32, i32) {
    %c0_i32 = arith.constant 0 : i32
    %c0_i32_0 = arith.constant 0 : i32
    %c0_i32_1 = arith.constant 0 : i32
    return %c0_i32, %c0_i32_0 : i32, i32
  }
  func.func @transform_12(%arg0: i32) -> (i32, i32) {
    %c0_i32 = arith.constant 0 : i32
    %c0_i32_0 = arith.constant 0 : i32
    %c0_i32_1 = arith.constant 0 : i32
    return %c0_i32, %c0_i32_0 : i32, i32
  }
  func.func @transform_13(%arg0: i32) -> (i32, i32) {
    %c0_i32 = arith.constant 0 : i32
    %c0_i32_0 = arith.constant 0 : i32
    return %arg0, %c0_i32 : i32, i32
  }
}

</mosaic_0001>

<bundles_post_ra>
// kernel: tpu_custom_call.1
= control target key start
LH: loop header
LB: loop body
LE: loop exit
PB: predicated region body
PF: predicated region fallthrough
CT: control target
= control target key end

     0   :  { %s1700_s0 = inlined_call_operand.vmem [shape: f32[16,32], index: 0, kind: input, shape index: {}]   ;;  %s1701_s1 = inlined_call_operand.vmem [shape: f32[1,32], index: 1, kind: input, shape index: {}]   ;;  %s1702_s2 = inlined_call_operand.vmem [shape: f32[1,32], index: 2, kind: input, shape index: {}]   ;;  %s1703_s3 = inlined_call_operand.vmem [shape: f32[32,96], index: 3, kind: input, shape index: {}]   ;;  %s1704_s4 = inlined_call_operand.vmem [shape: f32[1,96], index: 4, kind: input, shape index: {}]   ;;  %s1705_s5 = inlined_call_operand.vmem [shape: f32[32,32], index: 5, kind: input, shape index: {}]   ;;  %s1706_s6 = inlined_call_operand.vmem [shape: f32[1,32], index: 6, kind: input, shape index: {}]   ;;  %s1707_s7 = inlined_call_operand.vmem [shape: f32[1,32], index: 7, kind: input, shape index: {}]   ;;  %s1708_s8 = inlined_call_operand.vmem [shape: f32[1,32], index: 8, kind: input, shape index: {}]   ;;  %s1709_s9 = inlined_call_operand.vmem [shape: f32[32,128], index: 9, kind: input, shape index: {}]   ;;  %s1710_s10 = inlined_call_operand.vmem [shape: f32[1,128], index: 10, kind: input, shape index: {}]   ;;  %s1711_s11 = inlined_call_operand.vmem [shape: f32[128,32], index: 11, kind: input, shape index: {}]   ;;  %s1712_s12 = inlined_call_operand.vmem [shape: f32[1,32], index: 12, kind: input, shape index: {}]   ;;  %s1713_s13 = inlined_call_operand.hbm [shape: f32[16,32], index: 13, kind: output, shape index: {}]  }
   0x1   :  { %1714 = sst [smem:[#allocation5_spill]] %s1700_s0 }
   0x2   :  { %1715 = sst [smem:[#allocation6_spill]] %s1701_s1 }
   0x3   :  { %1716 = sst [smem:[#allocation7_spill]] %s1702_s2 }
   0x4   :  { %1717 = sst [smem:[#allocation8_spill]] %s1703_s3 }
   0x5   :  { %18 = vsyncpa [#allocation3], 0 }
   0x6   :  { %20 = vsyncpa [#allocation3 + $0x1], 0  ;;  %s1419_s25 = smov 0   ;;  %s1421_s26 = smov 0  }
   0x7   :  { %s1423_s27 = smov 0   ;;  %s1425_s28 = smov 0  }
   0x8 LB: > { %s1440_s29 = sadd.s32 4294967295, %s1335_s28   ;;  %s1161_s30 = sadd.s32 4294967294, %s1335_s28   ;;  %s1335_s28 = sphi %s1425_s28, %s1727_s28   ;;  %s1331_s27 = sphi %s1423_s27, %s1726_s27   ;;  %s1327_s26 = sphi %s1421_s26, %s1725_s26   ;;  %s1323_s25 = sphi %s1419_s25, %s1724_s25  }
   0x9   : > { %s1444_s14 = sadd.s32 1, %s1335_s28   ;;  %s311_s15 = sadd.s32 1, %s1331_s27 }
   0xa   : > { %s308_s16 = ssub.s32 %s1335_s28, %s1444_s14  ;;  %p321_p0 = scmp.ne.s32.totalorder %s1331_s27, %s1327_s26 }
   0xb   : > { %p309_p1 = scmp.eq.s32.totalorder %s308_s16, 0  ;;  %p322_p2 = scmp.eq.s32.totalorder %s1440_s29, 1 }
   0xc   : > { %p327_p3 = scmp.ne.s32.totalorder %s1327_s26, %s1323_s25  ;;  %p328_p4 = scmp.eq.s32.totalorder %s1161_s30, 1 }
   0xd   : > { %s1455_s17 = scalar_select %p309_p1, %s1331_s27, %s311_s15  }
   0xe   : > { %p1457_p5 = por %p322_p2, %p321_p0  ;;  %p1461_p6 = por %p328_p4, %p327_p3 }
   0xf   : > { %p1164_p7 = scmp.ge.s32.totalorder %s1335_s28, 1  ;;  %p389_p8 = scmp.lt.s32.totalorder %s1335_s28, 3 }
  0x11   : > { %p390_p9 = pnand %p1164_p7, %p389_p8 }
  0x12   : > { %p432_p10 = scmp.lt.s32.totalorder (!%p390_p9), %s1440_s29, 1  ;;  %s1720_s0 = sld [smem:[#allocation5_spill]] (!%p390_p9) }
  0x13   : > { %393 = sbr.rel (%p390_p9) target bundleno = 1974 (0x7b6), region = 72  ;;  %s1721_s3 = sld [smem:[#allocation8_spill]] (!%p390_p9) }
  0x14   : > { %s1722_s1 = sld [smem:[#allocation6_spill]] (!%p390_p9)  ;;  %s1338_s23 = smov (!%p390_p9), 112  }
  0x15   : > { %s1723_s2 = sld [smem:[#allocation7_spill]] (!%p390_p9)  ;;  %s1340_s30 = smov (!%p390_p9), 96  }
  0x16   : > { %s1341_s15 = smov (!%p390_p9), 80   ;;  %s1342_s16 = smov (!%p390_p9), 88  }
  0x17   : > { %s1345_s22 = smov (!%p390_p9), 48  }
  0x18   : > { %s433_s20 = scalar_select %p432_p10, %s1440_s29, 1  ;;  %vm439_vm0 = vcmask 261120   ;;  %v1337_v4 = vmov 32.0   ;;  %v1243_v35 = vld [vmem:[%s1704_s4] ss:$0 sm:$0xff]  ;;  %vm518_vm5 = vcmask 64512   ;;  %v510_v43 = vlaneseq }
  0x19   : > { %1249 = vrcp.f32 %v1337_v4  ;;  %v482_v10 = vld [vmem:[%s1721_s3 + $0x18] sm:$0xff]  ;;  %v481_v11 = vld [vmem:[%s1721_s3 + $0x10] sm:$0xff]  ;;  %v480_v13 = vld [vmem:[%s1721_s3 + $0x8] sm:$0xff] }
  0x1a   : > { %s1166_s21 = sshll.u32 %s433_s20, 3  ;;  %502 = vmatpush.msra.mxu0 %v482_v10  ;;  %v479_v15 = vld [vmem:[%s1721_s3] sm:$0xff]  ;;  %v1517_v44 = vshrl.u32 %v510_v43, 7  ;;  %v1519_v45 = vand.u32 127, %v510_v43  ;;  %s1343_s20 = smov 64  }
  0x1b   : > { %s435_s24 = scalar_lea.vmem %s1720_s0, %s1166_s21  ;;  %v1241_v29 = vld [vmem:[%s1722_s1] ss:$0 sm:$0xff]  ;;  %s1344_s21 = smov 56  }
  0x1c   : > { %v436_v0 = vld [vmem:[%s435_s24] sm:$0xff]  ;;  %503 = vmatpush.msra.mxu0 %v481_v11  ;;  %s1339_s24 = smov 120   ;;  %vm514_vm6 = vcmp.le.s32.totalorder %v1519_v45, %v1517_v44  ;;  %s1187_s0 = sshll.u32 %s1440_s29, 3 }
  0x1d   : > { %v440_v1 = vsel %vm439_vm0, %v436_v0, 0.0  ;;  %v451_v2 = vmul.f32 %v436_v0, %v436_v0  ;;  %v1242_v32 = vld [vmem:[%s1723_s2] ss:$0 sm:$0xff] }
  0x1e   : > { %441 = vadd.xlane.f32.xlu0 %v440_v1  ;;  %504 = vmatpush.msra.mxu0 %v480_v13 }
  0x1f   : > { %v452_v3 = vsel %vm439_vm0, %v451_v2, 0.0  ;;  %v1250_v5 = vpop.eup %1249 }
  0x20   : > { %v444_v6 = vmul.f32 32.0, %v1250_v5  ;;  %vm448_vm1 = vweird.f32 %v1250_v5  ;;  %505 = vmatpush.msra.mxu0 %v479_v15 }
  0x22   : > { %v445_v7 = vsub.f32 1.0, %v444_v6 }
  0x24   : > { %v446_v8 = vmul.f32 %v1250_v5, %v445_v7 }
  0x26   : > { %453 = vadd.xlane.f32.xlu0 %v452_v3  ;;  %v447_v9 = vadd.f32 %v1250_v5, %v446_v8 }
  0x28   : > { %v1483_v14 = vsel %vm448_vm1, %v1250_v5, %v447_v9 }
  0x91   : > { %v442_v12 = vpop.xlane.xlu0 %441 }
  0x92   : > { %v450_v16 = vmul.f32 %v1483_v14, %v442_v12 }
  0x94   : > { %v456_v18 = vmul.f32 %v450_v16, %v450_v16  ;;  %v458_v28 = vsub.f32 %v436_v0, %v450_v16 }
  0x99   : > { %v454_v17 = vpop.xlane.xlu0 %453 }
  0x9a   : > { %v455_v19 = vmul.f32 %v454_v17, %v1483_v14 }
  0x9c   : > { %v457_v20 = vsub.f32 %v455_v19, %v456_v18 }
  0x9e   : > { %v459_v21 = vadd.f32 1e-05, %v457_v20 }
  0xa0   : > { %1251 = vrsqrt.f32 %v459_v21  ;;  %vm466_vm3 = vweird.f32 %v459_v21 }
  0xa6   : > { %v1252_v22 = vpop.eup %1251 }
  0xa7   : > { %v461_v23 = vmul.f32 %v1252_v22, %v459_v21  ;;  %vm467_vm2 = vweird.f32 %v1252_v22 }
  0xa8   : > { %vm468_vm4 = vmor %vm466_vm3, %vm467_vm2 }
  0xa9   : > { %v462_v24 = vmul.f32 %v1252_v22, %v461_v23 }
  0xab   : > { %v463_v25 = vmul.f32 0.5, %v462_v24 }
  0xad   : > { %v464_v26 = vsub.f32 1.5, %v463_v25 }
  0xaf   : > { %v465_v27 = vmul.f32 %v1252_v22, %v464_v26 }
  0xb1   : > { %v469_v30 = vsel %vm468_vm4, %v1252_v22, %v465_v27 }
  0xb2   : > { %v470_v31 = vmul.f32 %v469_v30, %v458_v28 }
  0xb4   : > { %v474_v33 = vmul.f32 %v1241_v29, %v470_v31 }
  0xb6   : > { %v1496_v34 = vadd.f32 %v1242_v32, %v474_v33 }
  0xb8   : > { %1167 = vmatmul.msk.f32.vlgmr.msra.gmra.mxu0 %vm439_vm0, %v1496_v34 }
 0x135   : > { %v507_v36 = vpop.f32.mrf.mxu0 }
 0x136   : > { %v1503_v37 = vadd.f32 %v1243_v35, %v507_v36 }
 0x138   : > { %721 = vrot.lane.b32.xlu0 %v1503_v37, %s1338_s23  ;;  %595 = vrot.lane.b32.xlu2 %v1503_v37, %s1339_s24  ;;  %s1346_s23 = smov 72   ;;  %s1347_s24 = smov 104  }
 0x139   : > { %516 = vrot.lane.b32.xlu1 %v1503_v37, %s1340_s30  ;;  %s1348_s30 = smov 40  }
 0x140   : > { %723 = vrot.lane.b32.xlu2 %v1503_v37, %s1341_s15 }
 0x141   : > { %597 = vrot.lane.b32.xlu1 %v1503_v37, %s1342_s16 }
 0x192   : > { %v596_v38 = vpop.permute.xlu2 %595 }
 0x19a   : > { %v724_v41 = vpop.permute.xlu2 %723 }
 0x1aa   : > { %v722_v42 = vpop.permute.xlu0 %721 }
 0x1ab   : > { %v517_v39 = vpop.permute.xlu1 %516 }
 0x1ac   : > { %1168 = vmatpush.xpose.msk.msra.mxu1 %vm518_vm5, %v517_v39 }
 0x1af   : > { %1169 = vmatmul.msk.f32.vlgmr.msra.gmra.mxu1 %vm518_vm5, %v1503_v37 }
 0x1b3   : > { %v598_v40 = vpop.permute.xlu1 %597 }
 0x1b4   : > { %1171 = vmatpush.xpose.msk.msrb.mxu0 %vm518_vm5, %v598_v40 }
 0x1b7   : > { %1172 = vmatmul.msk.f32.vlgmr.msrb.gmra.mxu0 %vm518_vm5, %v596_v38 }
 0x1b8   : > { %1176 = vmatpush.xpose.msk.msra.mxu0 %vm518_vm5, %v724_v41 }
 0x1bf   : > { %1177 = vmatmul.msk.f32.vlgmr.msra.gmra.mxu0 %vm518_vm5, %v722_v42 }
 0x22c   : > { %v540_v46 = vpop.f32.mrf.mxu1 }
 0x22d   : > { %v543_v47 = vsel %vm514_vm6, %v540_v46, -inf }
 0x22e   : > { %v544_v48 = vsel %vm518_vm5, %v543_v47, -inf }
 0x22f   : > { %545 = vmax.xlane.f32.xlu1 %v544_v48 }
 0x234   : > { %v620_v49 = vpop.f32.mrf.mxu0 }
 0x235   : > { %v623_v50 = vsel %vm514_vm6, %v620_v49, -inf }
 0x236   : > { %v624_v51 = vsel %vm518_vm5, %v623_v50, -inf }
 0x237   : > { %625 = vmax.xlane.f32.xlu2 %v624_v51 }
 0x23c   : > { %v746_v52 = vpop.f32.mrf.mxu0 }
 0x23d   : > { %v749_v53 = vsel %vm514_vm6, %v746_v52, -inf  ;;  %v594_v52 = vld [vmem:[%s1705_s5] sm:$0xff] }
 0x23e   : > { %v750_v54 = vsel %vm518_vm5, %v749_v53, -inf  ;;  %716 = vmatpush.msra.mxu3 %v594_v52 }
 0x23f   : > { %751 = vmax.xlane.f32.xlu0 %v750_v54  ;;  %v800_v54 = vld [vmem:[%s1705_s5 + $0x10] sm:$0xff] }
 0x248   : > { %568 = vrot.lane.b32.xlu1 %v1503_v37, %s1343_s20  ;;  %s429_s20 = sand.u32 1, %s1327_s26  }
 0x249   : > { %s1087_s29 = scalar_lea.sflag [#allocation3], %s429_s20 }
 0x24f   : > { %648 = vrot.lane.b32.xlu2 %v1503_v37, %s1344_s21  ;;  %s1165_s21 = sshll.u32 %s429_s20, 3 }
 0x250   : > { %s431_s15 = scalar_lea.vmem [#allocation2], %s1165_s21  ;;  %s1293_s21 = scalar_lea.hbm %s1713_s13, 16 }
 0x251   : > { %s1099_s16 = sshll.u32 %s431_s15, 4  ;;  %s1100_s16 = int_to_ptr.vmem [resolvable:$true] %s1099_s16 }
 0x253   : > { %774 = vrot.lane.b32.xlu0 %v1503_v37, %s1345_s22 }
 0x2a2   : > { %v546_v55 = vpop.xlane.xlu1 %545 }
 0x2a3   : > { %v547_v56 = vsub.f32 %v543_v47, %v546_v55 }
 0x2a5   : > { %v548_v57 = vmul.f32 1.442695, %v547_v56 }
 0x2a7   : > { %1253 = vpow2.f32 %v548_v57 }
 0x2aa   : > { %v626_v58 = vpop.xlane.xlu2 %625 }
 0x2ab   : > { %v627_v59 = vsub.f32 %v623_v50, %v626_v58 }
 0x2ad   : > { %v1254_v60 = vpop.eup %1253  ;;  %v628_v61 = vmul.f32 1.442695, %v627_v59 }
 0x2ae   : > { %v550_v62 = vsel %vm518_vm5, %v1254_v60, 0.0 }
 0x2af   : > { %1255 = vpow2.f32 %v628_v61  ;;  %551 = vadd.xlane.f32.xlu2 %v550_v62 }
 0x2b2   : > { %v752_v63 = vpop.xlane.xlu0 %751  ;;  %v649_v5 = vpop.permute.xlu2 %648 }
 0x2b3   : > { %v753_v0 = vsub.f32 %v749_v53, %v752_v63  ;;  %v674_v53 = vld [vmem:[%s1705_s5 + $0x8] sm:$0xff] }
 0x2b4   : > { %693 = vmatpush.msrb.mxu1 %v674_v53  ;;  %v1059_v53 = vld [vmem:[%s1711_s11 + $0x78] sm:$0xff] }
 0x2b5   : > { %v1256_v1 = vpop.eup %1255  ;;  %v754_v2 = vmul.f32 1.442695, %v753_v0  ;;  %1064 = vmatpush.msrb.mxu3 %v1059_v53 }
 0x2b6   : > { %v630_v3 = vsel %vm518_vm5, %v1256_v1, 0.0  ;;  %819 = vmatpush.msra.mxu1 %v800_v54  ;;  %v1058_v54 = vld [vmem:[%s1711_s11 + $0x70] sm:$0xff] }
 0x2b7   : > { %1257 = vpow2.f32 %v754_v2  ;;  %631 = vadd.xlane.f32.xlu1 %v630_v3  ;;  %v904_v2 = vld [vmem:[%s1705_s5 + $0x18] sm:$0xff]  ;;  %1065 = vmatpush.msrb.mxu3 %v1058_v54 }
 0x2ba   : > { %v569_v4 = vpop.permute.xlu1 %568 }
 0x2bb   : > { %589 = vmatpush.msra.mxu2 %v569_v4 }
 0x2bd   : > { %669 = vmatpush.msrb.mxu2 %v649_v5  ;;  %v1540_v6 = vpop.eup %1257 }
 0x2be   : > { %v756_v7 = vsel %vm518_vm5, %v1540_v6, 0.0 }
 0x2bf   : > { %757 = vadd.xlane.f32.xlu2 %v756_v7 }
 0x2c5   : > { %v775_v29 = vpop.permute.xlu0 %774 }
 0x2d0   : > { %827 = vrot.lane.b32.xlu1 %v1503_v37, %s1346_s23 }
 0x2d7   : > { %825 = vrot.lane.b32.xlu2 %v1503_v37, %s1347_s24 }
 0x2df   : > { %878 = vrot.lane.b32.xlu2 %v1503_v37, %s1348_s30  ;;  %s1097_s30 = scalar_lea.hbm %s1713_s13, %s1187_s0 }
 0x2e0   : > { %s1101_s2 = sshll.u32 %s1097_s30, 4  ;;  %s1102_s2 = int_to_ptr.hbm [resolvable:$true] %s1101_s2 }
 0x2e1   : > { %s1287_s3 = sshra.s32 %s1102_s2, 4  ;;  %s1288_s3 = int_to_ptr.hbm [resolvable:$true] %s1287_s3 }
 0x2e2   : > { %s1289_s1 = scalar_lea.hbm %s1288_s3, 8  ;;  %p1294_p0 = scmp.lt.s32.totalorder %s1288_s3, %s1713_s13 }
 0x2e3   : > { %p1290_p11 = scmp.ne.s32.totalorder %s1288_s3, %s1289_s1  ;;  %p1295_p1 = scmp.lt.s32.totalorder %s1293_s21, %s1289_s1 }
 0x2e5   : > { %p1291_p12 = pnand %p1290_p11, %p1457_p5  ;;  %p1296_p2 = por %p1295_p1, %p1294_p0 }
 0x2e7   : > { %p1292_p13 = pneg %p1291_p12 }
 0x2e9   : > { %p1297_p3 = pnand %p1296_p2, %p1292_p13 }
 0x322   : > { %v552_v8 = vpop.xlane.xlu2 %551 }
 0x323   : > { %1259 = vrcp.f32 %v552_v8  ;;  %v564_v15 = vand.u32 2147483648, %v552_v8  ;;  %v562_v16 = vand.u32 2147483647, %v552_v8  ;;  %vm558_vm8 = vweird.f32 %v552_v8 }
 0x325   : > { %v565_v19 = vor.u32 1.1754944e-38, %v564_v15  ;;  %vm563_vm10 = vcmp.eq.f32.partialorder %v562_v16, 8.507059e+37 }
 0x329   : > { %v1260_v9 = vpop.eup %1259 }
 0x32a   : > { %v554_v10 = vmul.f32 %v1260_v9, %v552_v8  ;;  %v632_v11 = vpop.xlane.xlu1 %631  ;;  %vm559_vm7 = vweird.f32 %v1260_v9 }
 0x32b   : > { %1261 = vrcp.f32 %v632_v11  ;;  %vm560_vm9 = vmor %vm558_vm8, %vm559_vm7  ;;  %v644_v25 = vand.u32 2147483648, %v632_v11  ;;  %v642_v28 = vand.u32 2147483647, %v632_v11  ;;  %vm638_vm12 = vweird.f32 %v632_v11 }
 0x32c   : > { %v555_v12 = vsub.f32 1.0, %v554_v10 }
 0x32d   : > { %v645_v32 = vor.u32 1.1754944e-38, %v644_v25  ;;  %vm643_vm14 = vcmp.eq.f32.partialorder %v642_v28, 8.507059e+37  ;;  %v972_v28 = vld [vmem:[%s1709_s9 + $0x18] sm:$0xff] }
 0x32e   : > { %v556_v13 = vmul.f32 %v1260_v9, %v555_v12 }
 0x330   : > { %v557_v17 = vadd.f32 %v1260_v9, %v556_v13 }
 0x331   : > { %v1262_v18 = vpop.eup %1261 }
 0x332   : > { %v634_v20 = vmul.f32 %v1262_v18, %v632_v11  ;;  %v758_v21 = vpop.xlane.xlu2 %757  ;;  %v561_v22 = vsel %vm560_vm9, %v1260_v9, %v557_v17  ;;  %vm639_vm11 = vweird.f32 %v1262_v18 }
 0x333   : > { %1263 = vrcp.f32 %v758_v21  ;;  %v566_v24 = vsel %vm563_vm10, %v565_v19, %v561_v22  ;;  %vm640_vm13 = vmor %vm638_vm12, %vm639_vm11  ;;  %v770_v40 = vand.u32 2147483648, %v758_v21  ;;  %v768_v42 = vand.u32 2147483647, %v758_v21  ;;  %v1244_v22 = vld [vmem:[%s1706_s6] ss:$0 sm:$0xff] }
 0x334   : > { %v635_v23 = vsub.f32 1.0, %v634_v20  ;;  %v567_v26 = vmul.f32 %v1254_v60, %v566_v24  ;;  %vm764_vm1 = vweird.f32 %v758_v21 }
 0x335   : > { %v771_v46 = vor.u32 1.1754944e-38, %v770_v40  ;;  %vm769_vm3 = vcmp.eq.f32.partialorder %v768_v42, 8.507059e+37 }
 0x336   : > { %v636_v27 = vmul.f32 %v1262_v18, %v635_v23  ;;  %1170 = vmatmul.msk.f32.vlgmr.msra.gmra.mxu2 %vm518_vm5, %v567_v26 }
 0x337   : > { %795 = vmatpush.msra.mxu2 %v775_v29  ;;  %v970_v29 = vld [vmem:[%s1709_s9 + $0x8] sm:$0xff] }
 0x338   : > { %v637_v30 = vadd.f32 %v1262_v18, %v636_v27 }
 0x339   : > { %v1264_v31 = vpop.eup %1263 }
 0x33a   : > { %v760_v33 = vmul.f32 %v1264_v31, %v758_v21  ;;  %v826_v35 = vpop.permute.xlu2 %825  ;;  %v641_v36 = vsel %vm640_vm13, %v1262_v18, %v637_v30  ;;  %vm765_vm15 = vweird.f32 %v1264_v31  ;;  %v969_v30 = vld [vmem:[%s1709_s9] sm:$0xff] }
 0x33b   : > { %v646_v37 = vsel %vm643_vm14, %v645_v32, %v641_v36  ;;  %vm766_vm2 = vmor %vm764_vm1, %vm765_vm15 }
 0x33c   : > { %v761_v38 = vsub.f32 1.0, %v760_v33  ;;  %v647_v39 = vmul.f32 %v1256_v1, %v646_v37 }
 0x33e   : > { %v762_v41 = vmul.f32 %v1264_v31, %v761_v38  ;;  %1173 = vmatmul.msk.f32.vlgmr.msrb.gmra.mxu2 %vm518_vm5, %v647_v39 }
 0x340   : > { %v763_v43 = vadd.f32 %v1264_v31, %v762_v41 }
 0x342   : > { %v767_v47 = vsel %vm766_vm2, %v1264_v31, %v763_v43  ;;  %v879_v48 = vpop.permute.xlu2 %878  ;;  %v828_v49 = vpop.permute.xlu1 %827 }
 0x343   : > { %v772_v50 = vsel %vm769_vm3, %v771_v46, %v767_v47  ;;  %1180 = vmatpush.xpose.msk.msrb.mxu2 %vm518_vm5, %v828_v49  ;;  %899 = vmatpush.msrb.mxu0 %v879_v48  ;;  %v1245_v48 = vld [vmem:[%s1707_s7] ss:$0 sm:$0xff] }
 0x344   : > { %v773_v51 = vmul.f32 %v1540_v6, %v772_v50  ;;  %v1246_v50 = vld [vmem:[%s1708_s8] ss:$0 sm:$0xff] }
 0x346   : > { %1178 = vmatmul.msk.f32.vlgmr.msra.gmra.mxu2 %vm518_vm5, %v773_v51 }
 0x347   : > { %923 = vmatpush.msra.mxu2 %v904_v2 }
 0x34e   : > { %1181 = vmatmul.msk.f32.vlgmr.msrb.gmra.mxu2 %vm518_vm5, %v826_v35 }
 0x3b9   : > { %v591_v55 = vpop.f32.mrf.mxu2 }
 0x3ba   : > { %1175 = vmatmul.msk.f32.vlgmr.msra.gmra.mxu3 %vm518_vm5, %v591_v55  ;;  %v1057_v55 = vld [vmem:[%s1711_s11 + $0x68] sm:$0xff] }
 0x3bb   : > { %1066 = vmatpush.msrb.mxu3 %v1057_v55 }
 0x3c1   : > { %v671_v56 = vpop.f32.mrf.mxu2 }
 0x3c2   : > { %1174 = vmatmul.msk.f32.vlgmr.msrb.gmra.mxu1 %vm518_vm5, %v671_v56  ;;  %v1247_v56 = vld [vmem:[%s1710_s10] ss:$0 sm:$0xff] }
 0x3c3   : > { %992 = vmatpush.msrb.mxu1 %v972_v28 }
 0x3c9   : > { %v797_v57 = vpop.f32.mrf.mxu2 }
 0x3ca   : > { %1179 = vmatmul.msk.f32.vlgmr.msra.gmra.mxu1 %vm518_vm5, %v797_v57  ;;  %v1056_v57 = vld [vmem:[%s1711_s11 + $0x60] sm:$0xff] }
 0x3cb   : > { %1067 = vmatpush.msrb.mxu3 %v1056_v57 }
 0x3d1   : > { %v850_v58 = vpop.f32.mrf.mxu2 }
 0x3d2   : > { %v853_v59 = vsel %vm514_vm6, %v850_v58, -inf  ;;  %v1055_v58 = vld [vmem:[%s1711_s11 + $0x58] sm:$0xff] }
 0x3d3   : > { %v854_v60 = vsel %vm518_vm5, %v853_v59, -inf  ;;  %1068 = vmatpush.msrb.mxu3 %v1055_v58 }
 0x3d4   : > { %855 = vmax.xlane.f32.xlu0 %v854_v60 }
 0x43d   : > { %v718_v16 = vpop.f32.mrf.mxu3 }
 0x43f   : > { %v695_v15 = vpop.f32.mrf.mxu1 }
 0x440   : > { %v719_v18 = vadd.f32 %v718_v16, %v695_v15 }
 0x447   : > { %v856_v61 = vpop.xlane.xlu0 %855  ;;  %v821_v17 = vpop.f32.mrf.mxu1 }
 0x448   : > { %v857_v62 = vsub.f32 %v853_v59, %v856_v61  ;;  %v824_v19 = vadd.f32 %v821_v17, %v719_v18  ;;  %v1054_v61 = vld [vmem:[%s1711_s11 + $0x50] sm:$0xff]  ;;  %v1045_v17 = vld [vmem:[%s1711_s11 + $0x8] sm:$0xff] }
 0x449   : > { %1069 = vmatpush.msrb.mxu3 %v1054_v61 }
 0x44a   : > { %v858_v63 = vmul.f32 1.442695, %v857_v62 }
 0x44c   : > { %1265 = vpow2.f32 %v858_v63  ;;  %v1053_v63 = vld [vmem:[%s1711_s11 + $0x48] sm:$0xff] }
 0x44d   : > { %1070 = vmatpush.msrb.mxu3 %v1053_v63 }
 0x452   : > { %v1266_v0 = vpop.eup %1265 }
 0x453   : > { %v860_v1 = vsel %vm518_vm5, %v1266_v0, 0.0 }
 0x454   : > { %861 = vadd.xlane.f32.xlu1 %v860_v1  ;;  %v1052_v1 = vld [vmem:[%s1711_s11 + $0x40] sm:$0xff] }
 0x455   : > { %1071 = vmatpush.msrb.mxu3 %v1052_v1 }
 0x4c7   : > { %v862_v3 = vpop.xlane.xlu1 %861 }
 0x4c8   : > { %1267 = vrcp.f32 %v862_v3  ;;  %v874_v5 = vand.u32 2147483648, %v862_v3  ;;  %v872_v7 = vand.u32 2147483647, %v862_v3  ;;  %vm868_vm6 = vweird.f32 %v862_v3 }
 0x4ca   : > { %v875_v9 = vor.u32 1.1754944e-38, %v874_v5  ;;  %vm873_vm8 = vcmp.eq.f32.partialorder %v872_v7, 8.507059e+37  ;;  %v1049_v7 = vld [vmem:[%s1711_s11 + $0x28] sm:$0xff] }
 0x4ce   : > { %v1268_v44 = vpop.eup %1267 }
 0x4cf   : > { %v864_v45 = vmul.f32 %v1268_v44, %v862_v3  ;;  %vm869_vm4 = vweird.f32 %v1268_v44  ;;  %v1051_v3 = vld [vmem:[%s1711_s11 + $0x38] sm:$0xff] }
 0x4d0   : > { %vm870_vm7 = vmor %vm868_vm6, %vm869_vm4  ;;  %1072 = vmatpush.msrb.mxu3 %v1051_v3 }
 0x4d1   : > { %v865_v4 = vsub.f32 1.0, %v864_v45 }
 0x4d3   : > { %v866_v6 = vmul.f32 %v1268_v44, %v865_v4  ;;  %v1050_v4 = vld [vmem:[%s1711_s11 + $0x30] sm:$0xff] }
 0x4d4   : > { %1073 = vmatpush.msrb.mxu3 %v1050_v4 }
 0x4d5   : > { %v867_v8 = vadd.f32 %v1268_v44, %v866_v6 }
 0x4d6   : > { %1074 = vmatpush.msrb.mxu3 %v1049_v7 }
 0x4d7   : > { %v871_v10 = vsel %vm870_vm7, %v1268_v44, %v867_v8 }
 0x4d8   : > { %v876_v11 = vsel %vm873_vm8, %v875_v9, %v871_v10  ;;  %v1048_v10 = vld [vmem:[%s1711_s11 + $0x20] sm:$0xff] }
 0x4d9   : > { %v877_v12 = vmul.f32 %v1266_v0, %v876_v11  ;;  %1075 = vmatpush.msrb.mxu3 %v1048_v10  ;;  %v1047_v11 = vld [vmem:[%s1711_s11 + $0x18] sm:$0xff] }
 0x4db   : > { %1182 = vmatmul.msk.f32.vlgmr.msrb.gmra.mxu0 %vm518_vm5, %v877_v12  ;;  %1076 = vmatpush.msrb.mxu3 %v1047_v11 }
 0x558   : > { %v901_v13 = vpop.f32.mrf.mxu0 }
 0x559   : > { %1183 = vmatmul.msk.f32.vlgmr.msra.gmra.mxu2 %vm518_vm5, %v901_v13  ;;  %v1046_v13 = vld [vmem:[%s1711_s11 + $0x10] sm:$0xff] }
 0x55a   : > { %1077 = vmatpush.msrb.mxu3 %v1046_v13 }
 0x55c   : > { %1078 = vmatpush.msrb.mxu3 %v1045_v17 }
 0x5dc   : > { %v925_v20 = vpop.f32.mrf.mxu2 }
 0x5dd   : > { %v928_v21 = vadd.f32 %v925_v20, %v824_v19  ;;  %v1044_v19 = vld [vmem:[%s1711_s11] sm:$0xff] }
 0x5de   : > { %1079 = vmatpush.msrb.mxu3 %v1044_v19 }
 0x5df   : > { %v929_v23 = vadd.f32 %v928_v21, %v1496_v34  ;;  %v971_v34 = vld [vmem:[%s1709_s9 + $0x10] sm:$0xff] }
 0x5e0   : > { %993 = vmatpush.msrb.mxu1 %v971_v34 }
 0x5e1   : > { %v1579_v24 = vadd.f32 %v1244_v22, %v929_v23 }
 0x5e2   : > { %994 = vmatpush.msrb.mxu1 %v970_v29 }
 0x5e3   : > { %v937_v25 = vsel %vm439_vm0, %v1579_v24, 0.0  ;;  %v941_v26 = vmul.f32 %v1579_v24, %v1579_v24 }
 0x5e4   : > { %938 = vadd.xlane.f32.xlu2 %v937_v25  ;;  %995 = vmatpush.msrb.mxu1 %v969_v30 }
 0x5e5   : > { %v942_v27 = vsel %vm439_vm0, %v941_v26, 0.0 }
 0x5e6   : > { %943 = vadd.xlane.f32.xlu0 %v942_v27 }
 0x657   : > { %v939_v31 = vpop.xlane.xlu2 %938 }
 0x658   : > { %v940_v32 = vmul.f32 %v939_v31, %v1483_v14 }
 0x659   : > { %v944_v33 = vpop.xlane.xlu0 %943 }
 0x65a   : > { %v946_v35 = vmul.f32 %v940_v32, %v940_v32  ;;  %v945_v36 = vmul.f32 %v944_v33, %v1483_v14  ;;  %v948_v47 = vsub.f32 %v1579_v24, %v940_v32 }
 0x65c   : > { %v947_v37 = vsub.f32 %v945_v36, %v946_v35 }
 0x65e   : > { %v949_v38 = vadd.f32 1e-05, %v947_v37 }
 0x660   : > { %1269 = vrsqrt.f32 %v949_v38  ;;  %vm956_vm9 = vweird.f32 %v949_v38 }
 0x666   : > { %v1270_v39 = vpop.eup %1269 }
 0x667   : > { %v951_v40 = vmul.f32 %v1270_v39, %v949_v38  ;;  %vm957_vm5 = vweird.f32 %v1270_v39 }
 0x668   : > { %vm958_vm10 = vmor %vm956_vm9, %vm957_vm5 }
 0x669   : > { %v952_v41 = vmul.f32 %v1270_v39, %v951_v40 }
 0x66b   : > { %v953_v42 = vmul.f32 0.5, %v952_v41 }
 0x66d   : > { %v954_v43 = vsub.f32 1.5, %v953_v42 }
 0x66f   : > { %v955_v46 = vmul.f32 %v1270_v39, %v954_v43 }
 0x671   : > { %v959_v49 = vsel %vm958_vm10, %v1270_v39, %v955_v46 }
 0x672   : > { %v960_v14 = vmul.f32 %v959_v49, %v948_v47  ;;  %v1248_v49 = vld [vmem:[%s1712_s12] ss:$0 sm:$0xff] }
 0x674   : > { %v964_v51 = vmul.f32 %v1245_v48, %v960_v14 }
 0x676   : > { %v968_v52 = vadd.f32 %v1246_v50, %v964_v51 }
 0x678   : > { %1184 = vmatmul.msk.f32.vlgmr.msrb.gmra.mxu1 %vm439_vm0, %v968_v52 }
 0x6f5   : > { %v997_v59 = vpop.f32.mrf.mxu1 }
 0x6f6   : > { %v1626_v60 = vadd.f32 %v1247_v56, %v997_v59 }
 0x6f8   : > { %v1001_v62 = vmul.f32 0.70710677, %v1626_v60  ;;  %v1000_v46 = vmul.f32 0.5, %v1626_v60 }
 0x6fa   : > { %v1002_v0 = vmul.f32 %v1001_v62, %v1001_v62 }
 0x6fc   : > { %v1003_v2 = vmin.f32 %v1002_v0, 16.0 }
 0x6fe   : > { %v1004_v44 = vmul.f32 2.1237322e-06, %v1003_v2  ;;  %v1015_v45 = vmul.f32 3.8918573e-05, %v1003_v2 }
 0x700   : > { %v1005_v5 = vadd.f32 0.00028619796, %v1004_v44  ;;  %v1016_v6 = vadd.f32 0.001143296, %v1015_v45 }
 0x702   : > { %v1006_v8 = vmul.f32 %v1005_v5, %v1003_v2  ;;  %v1017_v9 = vmul.f32 %v1016_v6, %v1003_v2 }
 0x704   : > { %v1018_v12 = vadd.f32 0.014752088, %v1017_v9  ;;  %v1007_v15 = vadd.f32 0.0036580483, %v1006_v8 }
 0x706   : > { %v1019_v16 = vmul.f32 %v1018_v12, %v1003_v2  ;;  %v1008_v20 = vmul.f32 %v1007_v15, %v1003_v2 }
 0x708   : > { %v1020_v18 = vadd.f32 0.112945676, %v1019_v16  ;;  %v1009_v23 = vadd.f32 0.05243302, %v1008_v20 }
 0x70a   : > { %v1021_v21 = vmul.f32 %v1020_v18, %v1003_v2  ;;  %v1010_v27 = vmul.f32 %v1009_v23, %v1003_v2 }
 0x70c   : > { %v1022_v22 = vadd.f32 0.4994258, %v1021_v21  ;;  %v1011_v28 = vadd.f32 0.18741608, %v1010_v27 }
 0x70e   : > { %v1023_v25 = vmul.f32 %v1022_v22, %v1003_v2  ;;  %v1012_v29 = vmul.f32 %v1011_v28, %v1003_v2 }
 0x710   : > { %v1024_v26 = vadd.f32 1.0, %v1023_v25  ;;  %v1013_v33 = vadd.f32 1.1283791, %v1012_v29 }
 0x712   : > { %1271 = vrcp.f32 %v1024_v26  ;;  %v1036_v32 = vand.u32 2147483648, %v1024_v26  ;;  %v1034_v36 = vand.u32 2147483647, %v1024_v26  ;;  %vm1030_vm12 = vweird.f32 %v1024_v26 }
 0x713   : > { %v1014_v39 = vmul.f32 %v1013_v33, %v1001_v62 }
 0x714   : > { %v1037_v38 = vor.u32 1.1754944e-38, %v1036_v32  ;;  %vm1035_vm14 = vcmp.eq.f32.partialorder %v1034_v36, 8.507059e+37 }
 0x718   : > { %v1272_v34 = vpop.eup %1271 }
 0x719   : > { %v1026_v30 = vmul.f32 %v1272_v34, %v1024_v26  ;;  %vm1031_vm11 = vweird.f32 %v1272_v34 }
 0x71a   : > { %vm1032_vm13 = vmor %vm1030_vm12, %vm1031_vm11 }
 0x71b   : > { %v1027_v31 = vsub.f32 1.0, %v1026_v30 }
 0x71d   : > { %v1028_v35 = vmul.f32 %v1272_v34, %v1027_v31 }
 0x71f   : > { %v1029_v37 = vadd.f32 %v1272_v34, %v1028_v35 }
 0x721   : > { %v1033_v40 = vsel %vm1032_vm13, %v1272_v34, %v1029_v37 }
 0x722   : > { %v1038_v41 = vsel %vm1035_vm14, %v1037_v38, %v1033_v40 }
 0x723   : > { %v1039_v42 = vmul.f32 %v1038_v41, %v1014_v39 }
 0x725   : > { %v1185_v43 = vclamps-f32 %v1039_v42, 1.0 }
 0x727   : > { %v1042_v47 = vadd.f32 1.0, %v1185_v43 }
 0x729   : > { %v1043_v48 = vmul.f32 %v1042_v47, %v1000_v46 }
 0x72b   : > { %1080 = vmatmul.f32.vlgmr.msrb.gmra.mxu3 %v1043_v48 }
 0x7ae   : > { %v1081_v14 = vpop.f32.mrf.mxu3 }
 0x7af   : > { %v1082_v50 = vadd.f32 %v1248_v49, %v1081_v14 }
 0x7b1   : > { %v1084_v51 = vadd.f32 %v1082_v50, %v1579_v24 }
 0x7b3   : > { %1085 = vst.msk [vmem:[%s431_s15] sm:$0xff] %vm439_vm0, %v1084_v51 }
 0x7b4   : > { %1300 = shalt.err (!%p1297_p3)
}
 0x7b5   : > { %1190 = dma.vmem_to_hbm [thread:$0]  (%p1457_p5), %s1100_s16, 128, %s1102_s2, %s1087_s29  }
 0x7b6 PF: > { %p1196_p4 = scmp.ge.s32.totalorder %s1335_s28, 2  ;;  %s1113_s20 = sand.u32 1, %s1323_s25  }
 0x7b7   : > { %s1114_s30 = scalar_lea.sflag [#allocation3], %s1113_s20 }
 0x7b8   : > { %p1193_p7 = pnand %p1196_p4, %p1461_p6 }
 0x7ba   : > { %p1194_p8 = pneg %p1193_p7 }
 0x7bc   : > { %1318 = dma.done.wait (%p1194_p8), %s1114_s30, 128  }
 0x7bd   : > { %1320 = vsyncadd (%p1194_p8), %s1114_s30, 4294967168  ;;  %p23_p9 = scmp.ge.s32.totalorder %s1444_s14, 4   ;;  %s1724_s25 = smov %s1327_s26 }
 0x7be   : > { %s1725_s26 = smov %s1331_s27  ;;  %s1726_s27 = smov %s1455_s17 }
 0x7bf   : > { %s1727_s28 = smov %s1444_s14  ;;  %25 = sbr.rel (!%p23_p9) target bundleno = 8 (0x8), region = 107 }
 0x7c4   :  { %1120 = vsyncpa [#allocation3], 1 }
 0x7c5   :  { %1122 = vsyncpa [#allocation3 + $0x1], 1 }

// kernel: tpu_custom_call.1
= control target key start
LH: loop header
LB: loop body
LE: loop exit
PB: predicated region body
PF: predicated region fallthrough
CT: control target
= control target key end

     0   :  { %s1700_s0 = inlined_call_operand.vmem [shape: f32[16,32], index: 0, kind: input, shape index: {}]   ;;  %s1701_s1 = inlined_call_operand.vmem [shape: f32[1,32], index: 1, kind: input, shape index: {}]   ;;  %s1702_s2 = inlined_call_operand.vmem [shape: f32[1,32], index: 2, kind: input, shape index: {}]   ;;  %s1703_s3 = inlined_call_operand.vmem [shape: f32[32,96], index: 3, kind: input, shape index: {}]   ;;  %s1704_s4 = inlined_call_operand.vmem [shape: f32[1,96], index: 4, kind: input, shape index: {}]   ;;  %s1705_s5 = inlined_call_operand.vmem [shape: f32[32,32], index: 5, kind: input, shape index: {}]   ;;  %s1706_s6 = inlined_call_operand.vmem [shape: f32[1,32], index: 6, kind: input, shape index: {}]   ;;  %s1707_s7 = inlined_call_operand.vmem [shape: f32[1,32], index: 7, kind: input, shape index: {}]   ;;  %s1708_s8 = inlined_call_operand.vmem [shape: f32[1,32], index: 8, kind: input, shape index: {}]   ;;  %s1709_s9 = inlined_call_operand.vmem [shape: f32[32,128], index: 9, kind: input, shape index: {}]   ;;  %s1710_s10 = inlined_call_operand.vmem [shape: f32[1,128], index: 10, kind: input, shape index: {}]   ;;  %s1711_s11 = inlined_call_operand.vmem [shape: f32[128,32], index: 11, kind: input, shape index: {}]   ;;  %s1712_s12 = inlined_call_operand.vmem [shape: f32[1,32], index: 12, kind: input, shape index: {}]   ;;  %s1713_s13 = inlined_call_operand.hbm [shape: f32[16,32], index: 13, kind: output, shape index: {}]  }
   0x1   :  { %1714 = sst [smem:[#allocation5_spill]] %s1700_s0 }
   0x2   :  { %1715 = sst [smem:[#allocation6_spill]] %s1701_s1 }
   0x3   :  { %1716 = sst [smem:[#allocation7_spill]] %s1702_s2 }
   0x4   :  { %1717 = sst [smem:[#allocation8_spill]] %s1703_s3 }
   0x5   :  { %18 = vsyncpa [#allocation3], 0 }
   0x6   :  { %20 = vsyncpa [#allocation3 + $0x1], 0  ;;  %s1419_s25 = smov 0   ;;  %s1421_s26 = smov 0  }
   0x7   :  { %s1423_s27 = smov 0   ;;  %s1425_s28 = smov 0  }
   0x8 LB: > { %s1440_s29 = sadd.s32 4294967295, %s1335_s28   ;;  %s1161_s30 = sadd.s32 4294967294, %s1335_s28   ;;  %s1335_s28 = sphi %s1425_s28, %s1727_s28   ;;  %s1331_s27 = sphi %s1423_s27, %s1726_s27   ;;  %s1327_s26 = sphi %s1421_s26, %s1725_s26   ;;  %s1323_s25 = sphi %s1419_s25, %s1724_s25  }
   0x9   : > { %s1444_s14 = sadd.s32 1, %s1335_s28   ;;  %s311_s15 = sadd.s32 1, %s1331_s27 }
   0xa   : > { %s308_s16 = ssub.s32 %s1335_s28, %s1444_s14  ;;  %p321_p0 = scmp.ne.s32.totalorder %s1331_s27, %s1327_s26 }
   0xb   : > { %p309_p1 = scmp.eq.s32.totalorder %s308_s16, 0  ;;  %p322_p2 = scmp.eq.s32.totalorder %s1440_s29, 1 }
   0xc   : > { %p327_p3 = scmp.ne.s32.totalorder %s1327_s26, %s1323_s25  ;;  %p328_p4 = scmp.eq.s32.totalorder %s1161_s30, 1 }
   0xd   : > { %s1455_s17 = scalar_select %p309_p1, %s1331_s27, %s311_s15  }
   0xe   : > { %p1457_p5 = por %p322_p2, %p321_p0  ;;  %p1461_p6 = por %p328_p4, %p327_p3 }
   0xf   : > { %p1164_p7 = scmp.ge.s32.totalorder %s1335_s28, 1  ;;  %p389_p8 = scmp.lt.s32.totalorder %s1335_s28, 3 }
  0x11   : > { %p390_p9 = pnand %p1164_p7, %p389_p8 }
  0x12   : > { %p432_p10 = scmp.lt.s32.totalorder (!%p390_p9), %s1440_s29, 1  ;;  %s1720_s0 = sld [smem:[#allocation5_spill]] (!%p390_p9) }
  0x13   : > { %393 = sbr.rel (%p390_p9) target bundleno = 1974 (0x7b6), region = 72  ;;  %s1721_s3 = sld [smem:[#allocation8_spill]] (!%p390_p9) }
  0x14   : > { %s1722_s1 = sld [smem:[#allocation6_spill]] (!%p390_p9)  ;;  %s1338_s23 = smov (!%p390_p9), 112  }
  0x15   : > { %s1723_s2 = sld [smem:[#allocation7_spill]] (!%p390_p9)  ;;  %s1340_s30 = smov (!%p390_p9), 96  }
  0x16   : > { %s1341_s15 = smov (!%p390_p9), 80   ;;  %s1342_s16 = smov (!%p390_p9), 88  }
  0x17   : > { %s1345_s22 = smov (!%p390_p9), 48  }
  0x18   : > { %s433_s20 = scalar_select %p432_p10, %s1440_s29, 1  ;;  %vm439_vm0 = vcmask 261120   ;;  %v1337_v4 = vmov 32.0   ;;  %v1243_v35 = vld [vmem:[%s1704_s4] ss:$0 sm:$0xff]  ;;  %vm518_vm5 = vcmask 64512   ;;  %v510_v43 = vlaneseq }
  0x19   : > { %1249 = vrcp.f32 %v1337_v4  ;;  %v482_v10 = vld [vmem:[%s1721_s3 + $0x18] sm:$0xff]  ;;  %v481_v11 = vld [vmem:[%s1721_s3 + $0x10] sm:$0xff]  ;;  %v480_v13 = vld [vmem:[%s1721_s3 + $0x8] sm:$0xff] }
  0x1a   : > { %s1166_s21 = sshll.u32 %s433_s20, 3  ;;  %502 = vmatpush.msra.mxu0 %v482_v10  ;;  %v479_v15 = vld [vmem:[%s1721_s3] sm:$0xff]  ;;  %v1517_v44 = vshrl.u32 %v510_v43, 7  ;;  %v1519_v45 = vand.u32 127, %v510_v43  ;;  %s1343_s20 = smov 64  }
  0x1b   : > { %s435_s24 = scalar_lea.vmem %s1720_s0, %s1166_s21  ;;  %v1241_v29 = vld [vmem:[%s1722_s1] ss:$0 sm:$0xff]  ;;  %s1344_s21 = smov 56  }
  0x1c   : > { %v436_v0 = vld [vmem:[%s435_s24] sm:$0xff]  ;;  %503 = vmatpush.msra.mxu0 %v481_v11  ;;  %s1339_s24 = smov 120   ;;  %vm514_vm6 = vcmp.le.s32.totalorder %v1519_v45, %v1517_v44  ;;  %s1187_s0 = sshll.u32 %s1440_s29, 3 }
  0x1d   : > { %v440_v1 = vsel %vm439_vm0, %v436_v0, 0.0  ;;  %v451_v2 = vmul.f32 %v436_v0, %v436_v0  ;;  %v1242_v32 = vld [vmem:[%s1723_s2] ss:$0 sm:$0xff] }
  0x1e   : > { %441 = vadd.xlane.f32.xlu0 %v440_v1  ;;  %504 = vmatpush.msra.mxu0 %v480_v13 }
  0x1f   : > { %v452_v3 = vsel %vm439_vm0, %v451_v2, 0.0  ;;  %v1250_v5 = vpop.eup %1249 }
  0x20   : > { %v444_v6 = vmul.f32 32.0, %v1250_v5  ;;  %vm448_vm1 = vweird.f32 %v1250_v5  ;;  %505 = vmatpush.msra.mxu0 %v479_v15 }
  0x22   : > { %v445_v7 = vsub.f32 1.0, %v444_v6 }
  0x24   : > { %v446_v8 = vmul.f32 %v1250_v5, %v445_v7 }
  0x26   : > { %453 = vadd.xlane.f32.xlu0 %v452_v3  ;;  %v447_v9 = vadd.f32 %v1250_v5, %v446_v8 }
  0x28   : > { %v1483_v14 = vsel %vm448_vm1, %v1250_v5, %v447_v9 }
  0x91   : > { %v442_v12 = vpop.xlane.xlu0 %441 }
  0x92   : > { %v450_v16 = vmul.f32 %v1483_v14, %v442_v12 }
  0x94   : > { %v456_v18 = vmul.f32 %v450_v16, %v450_v16  ;;  %v458_v28 = vsub.f32 %v436_v0, %v450_v16 }
  0x99   : > { %v454_v17 = vpop.xlane.xlu0 %453 }
  0x9a   : > { %v455_v19 = vmul.f32 %v454_v17, %v1483_v14 }
  0x9c   : > { %v457_v20 = vsub.f32 %v455_v19, %v456_v18 }
  0x9e   : > { %v459_v21 = vadd.f32 1e-05, %v457_v20 }
  0xa0   : > { %1251 = vrsqrt.f32 %v459_v21  ;;  %vm466_vm3 = vweird.f32 %v459_v21 }
  0xa6   : > { %v1252_v22 = vpop.eup %1251 }
  0xa7   : > { %v461_v23 = vmul.f32 %v1252_v22, %v459_v21  ;;  %vm467_vm2 = vweird.f32 %v1252_v22 }
  0xa8   : > { %vm468_vm4 = vmor %vm466_vm3, %vm467_vm2 }
  0xa9   : > { %v462_v24 = vmul.f32 %v1252_v22, %v461_v23 }
  0xab   : > { %v463_v25 = vmul.f32 0.5, %v462_v24 }
  0xad   : > { %v464_v26 = vsub.f32 1.5, %v463_v25 }
  0xaf   : > { %v465_v27 = vmul.f32 %v1252_v22, %v464_v26 }
  0xb1   : > { %v469_v30 = vsel %vm468_vm4, %v1252_v22, %v465_v27 }
  0xb2   : > { %v470_v31 = vmul.f32 %v469_v30, %v458_v28 }
  0xb4   : > { %v474_v33 = vmul.f32 %v1241_v29, %v470_v31 }
  0xb6   : > { %v1496_v34 = vadd.f32 %v1242_v32, %v474_v33 }
  0xb8   : > { %1167 = vmatmul.msk.f32.vlgmr.msra.gmra.mxu0 %vm439_vm0, %v1496_v34 }
 0x135   : > { %v507_v36 = vpop.f32.mrf.mxu0 }
 0x136   : > { %v1503_v37 = vadd.f32 %v1243_v35, %v507_v36 }
 0x138   : > { %721 = vrot.lane.b32.xlu0 %v1503_v37, %s1338_s23  ;;  %595 = vrot.lane.b32.xlu2 %v1503_v37, %s1339_s24  ;;  %s1346_s23 = smov 72   ;;  %s1347_s24 = smov 104  }
 0x139   : > { %516 = vrot.lane.b32.xlu1 %v1503_v37, %s1340_s30  ;;  %s1348_s30 = smov 40  }
 0x140   : > { %723 = vrot.lane.b32.xlu2 %v1503_v37, %s1341_s15 }
 0x141   : > { %597 = vrot.lane.b32.xlu1 %v1503_v37, %s1342_s16 }
 0x192   : > { %v596_v38 = vpop.permute.xlu2 %595 }
 0x19a   : > { %v724_v41 = vpop.permute.xlu2 %723 }
 0x1aa   : > { %v722_v42 = vpop.permute.xlu0 %721 }
 0x1ab   : > { %v517_v39 = vpop.permute.xlu1 %516 }
 0x1ac   : > { %1168 = vmatpush.xpose.msk.msra.mxu1 %vm518_vm5, %v517_v39 }
 0x1af   : > { %1169 = vmatmul.msk.f32.vlgmr.msra.gmra.mxu1 %vm518_vm5, %v1503_v37 }
 0x1b3   : > { %v598_v40 = vpop.permute.xlu1 %597 }
 0x1b4   : > { %1171 = vmatpush.xpose.msk.msrb.mxu0 %vm518_vm5, %v598_v40 }
 0x1b7   : > { %1172 = vmatmul.msk.f32.vlgmr.msrb.gmra.mxu0 %vm518_vm5, %v596_v38 }
 0x1b8   : > { %1176 = vmatpush.xpose.msk.msra.mxu0 %vm518_vm5, %v724_v41 }
 0x1bf   : > { %1177 = vmatmul.msk.f32.vlgmr.msra.gmra.mxu0 %vm518_vm5, %v722_v42 }
 0x22c   : > { %v540_v46 = vpop.f32.mrf.mxu1 }
 0x22d   : > { %v543_v47 = vsel %vm514_vm6, %v540_v46, -inf }
 0x22e   : > { %v544_v48 = vsel %vm518_vm5, %v543_v47, -inf }
 0x22f   : > { %545 = vmax.xlane.f32.xlu1 %v544_v48 }
 0x234   : > { %v620_v49 = vpop.f32.mrf.mxu0 }
 0x235   : > { %v623_v50 = vsel %vm514_vm6, %v620_v49, -inf }
 0x236   : > { %v624_v51 = vsel %vm518_vm5, %v623_v50, -inf }
 0x237   : > { %625 = vmax.xlane.f32.xlu2 %v624_v51 }
 0x23c   : > { %v746_v52 = vpop.f32.mrf.mxu0 }
 0x23d   : > { %v749_v53 = vsel %vm514_vm6, %v746_v52, -inf  ;;  %v594_v52 = vld [vmem:[%s1705_s5] sm:$0xff] }
 0x23e   : > { %v750_v54 = vsel %vm518_vm5, %v749_v53, -inf  ;;  %716 = vmatpush.msra.mxu3 %v594_v52 }
 0x23f   : > { %751 = vmax.xlane.f32.xlu0 %v750_v54  ;;  %v800_v54 = vld [vmem:[%s1705_s5 + $0x10] sm:$0xff] }
 0x248   : > { %568 = vrot.lane.b32.xlu1 %v1503_v37, %s1343_s20  ;;  %s429_s20 = sand.u32 1, %s1327_s26  }
 0x249   : > { %s1087_s29 = scalar_lea.sflag [#allocation3], %s429_s20 }
 0x24f   : > { %648 = vrot.lane.b32.xlu2 %v1503_v37, %s1344_s21  ;;  %s1165_s21 = sshll.u32 %s429_s20, 3 }
 0x250   : > { %s431_s15 = scalar_lea.vmem [#allocation2], %s1165_s21  ;;  %s1293_s21 = scalar_lea.hbm %s1713_s13, 16 }
 0x251   : > { %s1099_s16 = sshll.u32 %s431_s15, 4  ;;  %s1100_s16 = int_to_ptr.vmem [resolvable:$true] %s1099_s16 }
 0x253   : > { %774 = vrot.lane.b32.xlu0 %v1503_v37, %s1345_s22 }
 0x2a2   : > { %v546_v55 = vpop.xlane.xlu1 %545 }
 0x2a3   : > { %v547_v56 = vsub.f32 %v543_v47, %v546_v55 }
 0x2a5   : > { %v548_v57 = vmul.f32 1.442695, %v547_v56 }
 0x2a7   : > { %1253 = vpow2.f32 %v548_v57 }
 0x2aa   : > { %v626_v58 = vpop.xlane.xlu2 %625 }
 0x2ab   : > { %v627_v59 = vsub.f32 %v623_v50, %v626_v58 }
 0x2ad   : > { %v1254_v60 = vpop.eup %1253  ;;  %v628_v61 = vmul.f32 1.442695, %v627_v59 }
 0x2ae   : > { %v550_v62 = vsel %vm518_vm5, %v1254_v60, 0.0 }
 0x2af   : > { %1255 = vpow2.f32 %v628_v61  ;;  %551 = vadd.xlane.f32.xlu2 %v550_v62 }
 0x2b2   : > { %v752_v63 = vpop.xlane.xlu0 %751  ;;  %v649_v5 = vpop.permute.xlu2 %648 }
 0x2b3   : > { %v753_v0 = vsub.f32 %v749_v53, %v752_v63  ;;  %v674_v53 = vld [vmem:[%s1705_s5 + $0x8] sm:$0xff] }
 0x2b4   : > { %693 = vmatpush.msrb.mxu1 %v674_v53  ;;  %v1059_v53 = vld [vmem:[%s1711_s11 + $0x78] sm:$0xff] }
 0x2b5   : > { %v1256_v1 = vpop.eup %1255  ;;  %v754_v2 = vmul.f32 1.442695, %v753_v0  ;;  %1064 = vmatpush.msrb.mxu3 %v1059_v53 }
 0x2b6   : > { %v630_v3 = vsel %vm518_vm5, %v1256_v1, 0.0  ;;  %819 = vmatpush.msra.mxu1 %v800_v54  ;;  %v1058_v54 = vld [vmem:[%s1711_s11 + $0x70] sm:$0xff] }
 0x2b7   : > { %1257 = vpow2.f32 %v754_v2  ;;  %631 = vadd.xlane.f32.xlu1 %v630_v3  ;;  %v904_v2 = vld [vmem:[%s1705_s5 + $0x18] sm:$0xff]  ;;  %1065 = vmatpush.msrb.mxu3 %v1058_v54 }
 0x2ba   : > { %v569_v4 = vpop.permute.xlu1 %568 }
 0x2bb   : > { %589 = vmatpush.msra.mxu2 %v569_v4 }
 0x2bd   : > { %669 = vmatpush.msrb.mxu2 %v649_v5  ;;  %v1540_v6 = vpop.eup %1257 }
 0x2be   : > { %v756_v7 = vsel %vm518_vm5, %v1540_v6, 0.0 }
 0x2bf   : > { %757 = vadd.xlane.f32.xlu2 %v756_v7 }
 0x2c5   : > { %v775_v29 = vpop.permute.xlu0 %774 }
 0x2d0   : > { %827 = vrot.lane.b32.xlu1 %v1503_v37, %s1346_s23 }
 0x2d7   : > { %825 = vrot.lane.b32.xlu2 %v1503_v37, %s1347_s24 }
 0x2df   : > { %878 = vrot.lane.b32.xlu2 %v1503_v37, %s1348_s30  ;;  %s1097_s30 = scalar_lea.hbm %s1713_s13, %s1187_s0 }
 0x2e0   : > { %s1101_s2 = sshll.u32 %s1097_s30, 4  ;;  %s1102_s2 = int_to_ptr.hbm [resolvable:$true] %s1101_s2 }
 0x2e1   : > { %s1287_s3 = sshra.s32 %s1102_s2, 4  ;;  %s1288_s3 = int_to_ptr.hbm [resolvable:$true] %s1287_s3 }
 0x2e2   : > { %s1289_s1 = scalar_lea.hbm %s1288_s3, 8  ;;  %p1294_p0 = scmp.lt.s32.totalorder %s1288_s3, %s1713_s13 }
 0x2e3   : > { %p1290_p11 = scmp.ne.s32.totalorder %s1288_s3, %s1289_s1  ;;  %p1295_p1 = scmp.lt.s32.totalorder %s1293_s21, %s1289_s1 }
 0x2e5   : > { %p1291_p12 = pnand %p1290_p11, %p1457_p5  ;;  %p1296_p2 = por %p1295_p1, %p1294_p0 }
 0x2e7   : > { %p1292_p13 = pneg %p1291_p12 }
 0x2e9   : > { %p1297_p3 = pnand %p1296_p2, %p1292_p13 }
 0x322   : > { %v552_v8 = vpop.xlane.xlu2 %551 }
 0x323   : > { %1259 = vrcp.f32 %v552_v8  ;;  %v564_v15 = vand.u32 2147483648, %v552_v8  ;;  %v562_v16 = vand.u32 2147483647, %v552_v8  ;;  %vm558_vm8 = vweird.f32 %v552_v8 }
 0x325   : > { %v565_v19 = vor.u32 1.1754944e-38, %v564_v15  ;;  %vm563_vm10 = vcmp.eq.f32.partialorder %v562_v16, 8.507059e+37 }
 0x329   : > { %v1260_v9 = vpop.eup %1259 }
 0x32a   : > { %v554_v10 = vmul.f32 %v1260_v9, %v552_v8  ;;  %v632_v11 = vpop.xlane.xlu1 %631  ;;  %vm559_vm7 = vweird.f32 %v1260_v9 }
 0x32b   : > { %1261 = vrcp.f32 %v632_v11  ;;  %vm560_vm9 = vmor %vm558_vm8, %vm559_vm7  ;;  %v644_v25 = vand.u32 2147483648, %v632_v11  ;;  %v642_v28 = vand.u32 2147483647, %v632_v11  ;;  %vm638_vm12 = vweird.f32 %v632_v11 }
 0x32c   : > { %v555_v12 = vsub.f32 1.0, %v554_v10 }
 0x32d   : > { %v645_v32 = vor.u32 1.1754944e-38, %v644_v25  ;;  %vm643_vm14 = vcmp.eq.f32.partialorder %v642_v28, 8.507059e+37  ;;  %v972_v28 = vld [vmem:[%s1709_s9 + $0x18] sm:$0xff] }
 0x32e   : > { %v556_v13 = vmul.f32 %v1260_v9, %v555_v12 }
 0x330   : > { %v557_v17 = vadd.f32 %v1260_v9, %v556_v13 }
 0x331   : > { %v1262_v18 = vpop.eup %1261 }
 0x332   : > { %v634_v20 = vmul.f32 %v1262_v18, %v632_v11  ;;  %v758_v21 = vpop.xlane.xlu2 %757  ;;  %v561_v22 = vsel %vm560_vm9, %v1260_v9, %v557_v17  ;;  %vm639_vm11 = vweird.f32 %v1262_v18 }
 0x333   : > { %1263 = vrcp.f32 %v758_v21  ;;  %v566_v24 = vsel %vm563_vm10, %v565_v19, %v561_v22  ;;  %vm640_vm13 = vmor %vm638_vm12, %vm639_vm11  ;;  %v770_v40 = vand.u32 2147483648, %v758_v21  ;;  %v768_v42 = vand.u32 2147483647, %v758_v21  ;;  %v1244_v22 = vld [vmem:[%s1706_s6] ss:$0 sm:$0xff] }
 0x334   : > { %v635_v23 = vsub.f32 1.0, %v634_v20  ;;  %v567_v26 = vmul.f32 %v1254_v60, %v566_v24  ;;  %vm764_vm1 = vweird.f32 %v758_v21 }
 0x335   : > { %v771_v46 = vor.u32 1.1754944e-38, %v770_v40  ;;  %vm769_vm3 = vcmp.eq.f32.partialorder %v768_v42, 8.507059e+37 }
 0x336   : > { %v636_v27 = vmul.f32 %v1262_v18, %v635_v23  ;;  %1170 = vmatmul.msk.f32.vlgmr.msra.gmra.mxu2 %vm518_vm5, %v567_v26 }
 0x337   : > { %795 = vmatpush.msra.mxu2 %v775_v29  ;;  %v970_v29 = vld [vmem:[%s1709_s9 + $0x8] sm:$0xff] }
 0x338   : > { %v637_v30 = vadd.f32 %v1262_v18, %v636_v27 }
 0x339   : > { %v1264_v31 = vpop.eup %1263 }
 0x33a   : > { %v760_v33 = vmul.f32 %v1264_v31, %v758_v21  ;;  %v826_v35 = vpop.permute.xlu2 %825  ;;  %v641_v36 = vsel %vm640_vm13, %v1262_v18, %v637_v30  ;;  %vm765_vm15 = vweird.f32 %v1264_v31  ;;  %v969_v30 = vld [vmem:[%s1709_s9] sm:$0xff] }
 0x33b   : > { %v646_v37 = vsel %vm643_vm14, %v645_v32, %v641_v36  ;;  %vm766_vm2 = vmor %vm764_vm1, %vm765_vm15 }
 0x33c   : > { %v761_v38 = vsub.f32 1.0, %v760_v33  ;;  %v647_v39 = vmul.f32 %v1256_v1, %v646_v37 }
 0x33e   : > { %v762_v41 = vmul.f32 %v1264_v31, %v761_v38  ;;  %1173 = vmatmul.msk.f32.vlgmr.msrb.gmra.mxu2 %vm518_vm5, %v647_v39 }
 0x340   : > { %v763_v43 = vadd.f32 %v1264_v31, %v762_v41 }
 0x342   : > { %v767_v47 = vsel %vm766_vm2, %v1264_v31, %v763_v43  ;;  %v879_v48 = vpop.permute.xlu2 %878  ;;  %v828_v49 = vpop.permute.xlu1 %827 }
 0x343   : > { %v772_v50 = vsel %vm769_vm3, %v771_v46, %v767_v47  ;;  %1180 = vmatpush.xpose.msk.msrb.mxu2 %vm518_vm5, %v828_v49  ;;  %899 = vmatpush.msrb.mxu0 %v879_v48  ;;  %v1245_v48 = vld [vmem:[%s1707_s7] ss:$0 sm:$0xff] }
 0x344   : > { %v773_v51 = vmul.f32 %v1540_v6, %v772_v50  ;;  %v1246_v50 = vld [vmem:[%s1708_s8] ss:$0 sm:$0xff] }
 0x346   : > { %1178 = vmatmul.msk.f32.vlgmr.msra.gmra.mxu2 %vm518_vm5, %v773_v51 }
 0x347   : > { %923 = vmatpush.msra.mxu2 %v904_v2 }
 0x34e   : > { %1181 = vmatmul.msk.f32.vlgmr.msrb.gmra.mxu2 %vm518_vm5, %v826_v35 }
 0x3b9   : > { %v591_v55 = vpop.f32.mrf.mxu2 }
 0x3ba   : > { %1175 = vmatmul.msk.f32.vlgmr.msra.gmra.mxu3 %vm518_vm5, %v591_v55  ;;  %v1057_v55 = vld [vmem:[%s1711_s11 + $0x68] sm:$0xff] }
 0x3bb   : > { %1066 = vmatpush.msrb.mxu3 %v1057_v55 }
 0x3c1   : > { %v671_v56 = vpop.f32.mrf.mxu2 }
 0x3c2   : > { %1174 = vmatmul.msk.f32.vlgmr.msrb.gmra.mxu1 %vm518_vm5, %v671_v56  ;;  %v1247_v56 = vld [vmem:[%s1710_s10] ss:$0 sm:$0xff] }
 0x3c3   : > { %992 = vmatpush.msrb.mxu1 %v972_v28 }
 0x3c9   : > { %v797_v57 = vpop.f32.mrf.mxu2 }
 0x3ca   : > { %1179 = vmatmul.msk.f32.vlgmr.msra.gmra.mxu1 %vm518_vm5, %v797_v57  ;;  %v1056_v57 = vld [vmem:[%s1711_s11 + $0x60] sm:$0xff] }
 0x3cb   : > { %1067 = vmatpush.msrb.mxu3 %v1056_v57 }
 0x3d1   : > { %v850_v58 = vpop.f32.mrf.mxu2 }
 0x3d2   : > { %v853_v59 = vsel %vm514_vm6, %v850_v58, -inf  ;;  %v1055_v58 = vld [vmem:[%s1711_s11 + $0x58] sm:$0xff] }
 0x3d3   : > { %v854_v60 = vsel %vm518_vm5, %v853_v59, -inf  ;;  %1068 = vmatpush.msrb.mxu3 %v1055_v58 }
 0x3d4   : > { %855 = vmax.xlane.f32.xlu0 %v854_v60 }
 0x43d   : > { %v718_v16 = vpop.f32.mrf.mxu3 }
 0x43f   : > { %v695_v15 = vpop.f32.mrf.mxu1 }
 0x440   : > { %v719_v18 = vadd.f32 %v718_v16, %v695_v15 }
 0x447   : > { %v856_v61 = vpop.xlane.xlu0 %855  ;;  %v821_v17 = vpop.f32.mrf.mxu1 }
 0x448   : > { %v857_v62 = vsub.f32 %v853_v59, %v856_v61  ;;  %v824_v19 = vadd.f32 %v821_v17, %v719_v18  ;;  %v1054_v61 = vld [vmem:[%s1711_s11 + $0x50] sm:$0xff]  ;;  %v1045_v17 = vld [vmem:[%s1711_s11 + $0x8] sm:$0xff] }
 0x449   : > { %1069 = vmatpush.msrb.mxu3 %v1054_v61 }
 0x44a   : > { %v858_v63 = vmul.f32 1.442695, %v857_v62 }
 0x44c   : > { %1265 = vpow2.f32 %v858_v63  ;;  %v1053_v63 = vld [vmem:[%s1711_s11 + $0x48] sm:$0xff] }
 0x44d   : > { %1070 = vmatpush.msrb.mxu3 %v1053_v63 }
 0x452   : > { %v1266_v0 = vpop.eup %1265 }
 0x453   : > { %v860_v1 = vsel %vm518_vm5, %v1266_v0, 0.0 }
 0x454   : > { %861 = vadd.xlane.f32.xlu1 %v860_v1  ;;  %v1052_v1 = vld [vmem:[%s1711_s11 + $0x40] sm:$0xff] }
 0x455   : > { %1071 = vmatpush.msrb.mxu3 %v1052_v1 }
 0x4c7   : > { %v862_v3 = vpop.xlane.xlu1 %861 }
 0x4c8   : > { %1267 = vrcp.f32 %v862_v3  ;;  %v874_v5 = vand.u32 2147483648, %v862_v3  ;;  %v872_v7 = vand.u32 2147483647, %v862_v3  ;;  %vm868_vm6 = vweird.f32 %v862_v3 }
 0x4ca   : > { %v875_v9 = vor.u32 1.1754944e-38, %v874_v5  ;;  %vm873_vm8 = vcmp.eq.f32.partialorder %v872_v7, 8.507059e+37  ;;  %v1049_v7 = vld [vmem:[%s1711_s11 + $0x28] sm:$0xff] }
 0x4ce   : > { %v1268_v44 = vpop.eup %1267 }
 0x4cf   : > { %v864_v45 = vmul.f32 %v1268_v44, %v862_v3  ;;  %vm869_vm4 = vweird.f32 %v1268_v44  ;;  %v1051_v3 = vld [vmem:[%s1711_s11 + $0x38] sm:$0xff] }
 0x4d0   : > { %vm870_vm7 = vmor %vm868_vm6, %vm869_vm4  ;;  %1072 = vmatpush.msrb.mxu3 %v1051_v3 }
 0x4d1   : > { %v865_v4 = vsub.f32 1.0, %v864_v45 }
 0x4d3   : > { %v866_v6 = vmul.f32 %v1268_v44, %v865_v4  ;;  %v1050_v4 = vld [vmem:[%s1711_s11 + $0x30] sm:$0xff] }
 0x4d4   : > { %1073 = vmatpush.msrb.mxu3 %v1050_v4 }
 0x4d5   : > { %v867_v8 = vadd.f32 %v1268_v44, %v866_v6 }
 0x4d6   : > { %1074 = vmatpush.msrb.mxu3 %v1049_v7 }
 0x4d7   : > { %v871_v10 = vsel %vm870_vm7, %v1268_v44, %v867_v8 }
 0x4d8   : > { %v876_v11 = vsel %vm873_vm8, %v875_v9, %v871_v10  ;;  %v1048_v10 = vld [vmem:[%s1711_s11 + $0x20] sm:$0xff] }
 0x4d9   : > { %v877_v12 = vmul.f32 %v1266_v0, %v876_v11  ;;  %1075 = vmatpush.msrb.mxu3 %v1048_v10  ;;  %v1047_v11 = vld [vmem:[%s1711_s11 + $0x18] sm:$0xff] }
 0x4db   : > { %1182 = vmatmul.msk.f32.vlgmr.msrb.gmra.mxu0 %vm518_vm5, %v877_v12  ;;  %1076 = vmatpush.msrb.mxu3 %v1047_v11 }
 0x558   : > { %v901_v13 = vpop.f32.mrf.mxu0 }
 0x559   : > { %1183 = vmatmul.msk.f32.vlgmr.msra.gmra.mxu2 %vm518_vm5, %v901_v13  ;;  %v1046_v13 = vld [vmem:[%s1711_s11 + $0x10] sm:$0xff] }
 0x55a   : > { %1077 = vmatpush.msrb.mxu3 %v1046_v13 }
 0x55c   : > { %1078 = vmatpush.msrb.mxu3 %v1045_v17 }
 0x5dc   : > { %v925_v20 = vpop.f32.mrf.mxu2 }
 0x5dd   : > { %v928_v21 = vadd.f32 %v925_v20, %v824_v19  ;;  %v1044_v19 = vld [vmem:[%s1711_s11] sm:$0xff] }
 0x5de   : > { %1079 = vmatpush.msrb.mxu3 %v1044_v19 }
 0x5df   : > { %v929_v23 = vadd.f32 %v928_v21, %v1496_v34  ;;  %v971_v34 = vld [vmem:[%s1709_s9 + $0x10] sm:$0xff] }
 0x5e0   : > { %993 = vmatpush.msrb.mxu1 %v971_v34 }
 0x5e1   : > { %v1579_v24 = vadd.f32 %v1244_v22, %v929_v23 }
 0x5e2   : > { %994 = vmatpush.msrb.mxu1 %v970_v29 }
 0x5e3   : > { %v937_v25 = vsel %vm439_vm0, %v1579_v24, 0.0  ;;  %v941_v26 = vmul.f32 %v1579_v24, %v1579_v24 }
 0x5e4   : > { %938 = vadd.xlane.f32.xlu2 %v937_v25  ;;  %995 = vmatpush.msrb.mxu1 %v969_v30 }
 0x5e5   : > { %v942_v27 = vsel %vm439_vm0, %v941_v26, 0.0 }
 0x5e6   : > { %943 = vadd.xlane.f32.xlu0 %v942_v27 }
 0x657   : > { %v939_v31 = vpop.xlane.xlu2 %938 }
 0x658   : > { %v940_v32 = vmul.f32 %v939_v31, %v1483_v14 }
 0x659   : > { %v944_v33 = vpop.xlane.xlu0 %943 }
 0x65a   : > { %v946_v35 = vmul.f32 %v940_v32, %v940_v32  ;;  %v945_v36 = vmul.f32 %v944_v33, %v1483_v14  ;;  %v948_v47 = vsub.f32 %v1579_v24, %v940_v32 }
 0x65c   : > { %v947_v37 = vsub.f32 %v945_v36, %v946_v35 }
 0x65e   : > { %v949_v38 = vadd.f32 1e-05, %v947_v37 }
 0x660   : > { %1269 = vrsqrt.f32 %v949_v38  ;;  %vm956_vm9 = vweird.f32 %v949_v38 }
 0x666   : > { %v1270_v39 = vpop.eup %1269 }
 0x667   : > { %v951_v40 = vmul.f32 %v1270_v39, %v949_v38  ;;  %vm957_vm5 = vweird.f32 %v1270_v39 }
 0x668   : > { %vm958_vm10 = vmor %vm956_vm9, %vm957_vm5 }
 0x669   : > { %v952_v41 = vmul.f32 %v1270_v39, %v951_v40 }
 0x66b   : > { %v953_v42 = vmul.f32 0.5, %v952_v41 }
 0x66d   : > { %v954_v43 = vsub.f32 1.5, %v953_v42 }
 0x66f   : > { %v955_v46 = vmul.f32 %v1270_v39, %v954_v43 }
 0x671   : > { %v959_v49 = vsel %vm958_vm10, %v1270_v39, %v955_v46 }
 0x672   : > { %v960_v14 = vmul.f32 %v959_v49, %v948_v47  ;;  %v1248_v49 = vld [vmem:[%s1712_s12] ss:$0 sm:$0xff] }
 0x674   : > { %v964_v51 = vmul.f32 %v1245_v48, %v960_v14 }
 0x676   : > { %v968_v52 = vadd.f32 %v1246_v50, %v964_v51 }
 0x678   : > { %1184 = vmatmul.msk.f32.vlgmr.msrb.gmra.mxu1 %vm439_vm0, %v968_v52 }
 0x6f5   : > { %v997_v59 = vpop.f32.mrf.mxu1 }
 0x6f6   : > { %v1626_v60 = vadd.f32 %v1247_v56, %v997_v59 }
 0x6f8   : > { %v1001_v62 = vmul.f32 0.70710677, %v1626_v60  ;;  %v1000_v46 = vmul.f32 0.5, %v1626_v60 }
 0x6fa   : > { %v1002_v0 = vmul.f32 %v1001_v62, %v1001_v62 }
 0x6fc   : > { %v1003_v2 = vmin.f32 %v1002_v0, 16.0 }
 0x6fe   : > { %v1004_v44 = vmul.f32 2.1237322e-06, %v1003_v2  ;;  %v1015_v45 = vmul.f32 3.8918573e-05, %v1003_v2 }
 0x700   : > { %v1005_v5 = vadd.f32 0.00028619796, %v1004_v44  ;;  %v1016_v6 = vadd.f32 0.001143296, %v1015_v45 }
 0x702   : > { %v1006_v8 = vmul.f32 %v1005_v5, %v1003_v2  ;;  %v1017_v9 = vmul.f32 %v1016_v6, %v1003_v2 }
 0x704   : > { %v1018_v12 = vadd.f32 0.014752088, %v1017_v9  ;;  %v1007_v15 = vadd.f32 0.0036580483, %v1006_v8 }
 0x706   : > { %v1019_v16 = vmul.f32 %v1018_v12, %v1003_v2  ;;  %v1008_v20 = vmul.f32 %v1007_v15, %v1003_v2 }
 0x708   : > { %v1020_v18 = vadd.f32 0.112945676, %v1019_v16  ;;  %v1009_v23 = vadd.f32 0.05243302, %v1008_v20 }
 0x70a   : > { %v1021_v21 = vmul.f32 %v1020_v18, %v1003_v2  ;;  %v1010_v27 = vmul.f32 %v1009_v23, %v1003_v2 }
 0x70c   : > { %v1022_v22 = vadd.f32 0.4994258, %v1021_v21  ;;  %v1011_v28 = vadd.f32 0.18741608, %v1010_v27 }
 0x70e   : > { %v1023_v25 = vmul.f32 %v1022_v22, %v1003_v2  ;;  %v1012_v29 = vmul.f32 %v1011_v28, %v1003_v2 }
 0x710   : > { %v1024_v26 = vadd.f32 1.0, %v1023_v25  ;;  %v1013_v33 = vadd.f32 1.1283791, %v1012_v29 }
 0x712   : > { %1271 = vrcp.f32 %v1024_v26  ;;  %v1036_v32 = vand.u32 2147483648, %v1024_v26  ;;  %v1034_v36 = vand.u32 2147483647, %v1024_v26  ;;  %vm1030_vm12 = vweird.f32 %v1024_v26 }
 0x713   : > { %v1014_v39 = vmul.f32 %v1013_v33, %v1001_v62 }
 0x714   : > { %v1037_v38 = vor.u32 1.1754944e-38, %v1036_v32  ;;  %vm1035_vm14 = vcmp.eq.f32.partialorder %v1034_v36, 8.507059e+37 }
 0x718   : > { %v1272_v34 = vpop.eup %1271 }
 0x719   : > { %v1026_v30 = vmul.f32 %v1272_v34, %v1024_v26  ;;  %vm1031_vm11 = vweird.f32 %v1272_v34 }
 0x71a   : > { %vm1032_vm13 = vmor %vm1030_vm12, %vm1031_vm11 }
 0x71b   : > { %v1027_v31 = vsub.f32 1.0, %v1026_v30 }
 0x71d   : > { %v1028_v35 = vmul.f32 %v1272_v34, %v1027_v31 }
 0x71f   : > { %v1029_v37 = vadd.f32 %v1272_v34, %v1028_v35 }
 0x721   : > { %v1033_v40 = vsel %vm1032_vm13, %v1272_v34, %v1029_v37 }
 0x722   : > { %v1038_v41 = vsel %vm1035_vm14, %v1037_v38, %v1033_v40 }
 0x723   : > { %v1039_v42 = vmul.f32 %v1038_v41, %v1014_v39 }
 0x725   : > { %v1185_v43 = vclamps-f32 %v1039_v42, 1.0 }
 0x727   : > { %v1042_v47 = vadd.f32 1.0, %v1185_v43 }
 0x729   : > { %v1043_v48 = vmul.f32 %v1042_v47, %v1000_v46 }
 0x72b   : > { %1080 = vmatmul.f32.vlgmr.msrb.gmra.mxu3 %v1043_v48 }
 0x7ae   : > { %v1081_v14 = vpop.f32.mrf.mxu3 }
 0x7af   : > { %v1082_v50 = vadd.f32 %v1248_v49, %v1081_v14 }
 0x7b1   : > { %v1084_v51 = vadd.f32 %v1082_v50, %v1579_v24 }
 0x7b3   : > { %1085 = vst.msk [vmem:[%s431_s15] sm:$0xff] %vm439_vm0, %v1084_v51 }
 0x7b4   : > { %1300 = shalt.err (!%p1297_p3)
}
 0x7b5   : > { %1190 = dma.vmem_to_hbm [thread:$0]  (%p1457_p5), %s1100_s16, 128, %s1102_s2, %s1087_s29  }
 0x7b6 PF: > { %p1196_p4 = scmp.ge.s32.totalorder %s1335_s28, 2  ;;  %s1113_s20 = sand.u32 1, %s1323_s25  }
 0x7b7   : > { %s1114_s30 = scalar_lea.sflag [#allocation3], %s1113_s20 }
 0x7b8   : > { %p1193_p7 = pnand %p1196_p4, %p1461_p6 }
 0x7ba   : > { %p1194_p8 = pneg %p1193_p7 }
 0x7bc   : > { %1318 = dma.done.wait (%p1194_p8), %s1114_s30, 128  }
 0x7bd   : > { %1320 = vsyncadd (%p1194_p8), %s1114_s30, 4294967168  ;;  %p23_p9 = scmp.ge.s32.totalorder %s1444_s14, 4   ;;  %s1724_s25 = smov %s1327_s26 }
 0x7be   : > { %s1725_s26 = smov %s1331_s27  ;;  %s1726_s27 = smov %s1455_s17 }
 0x7bf   : > { %s1727_s28 = smov %s1444_s14  ;;  %25 = sbr.rel (!%p23_p9) target bundleno = 8 (0x8), region = 107 }
 0x7c4   :  { %1120 = vsyncpa [#allocation3], 1 }
 0x7c5   :  { %1122 = vsyncpa [#allocation3 + $0x1], 1 }

</bundles_post_ra>
